<compile_context>
chip_gen: v7x
topology: tpu7x:2x2x1
jax: 0.10.0
libtpu: 0.0.40
codegen_flags: <defaults>
</compile_context>

<pallas_src>
import numpy as np
import jax
import jax.numpy as jnp
from jax import lax
from jax.experimental import pallas as pl
from jax.experimental.pallas import tpu as pltpu

# ----------------------------- tiny T5 config -----------------------------
VOCAB = 32
D_MODEL = 32
N_HEADS = 4
D_KV = 8
INNER = N_HEADS * D_KV          # 32
D_FF = 64
NUM_BUCKETS = 8
MAX_DISTANCE = 16
EPS_LN = 1e-6
PAD_ID = 0
EOS_ID = 2
DEC_START_ID = 0
NEG_INF = -1e9
MAX_TB = 16                     # examples stacked per grid step

# column offsets inside the packed (D_MODEL, W32_COLS) weight slab (all have 32 rows)
_O_SHARED = 0
_O_E_QKV = _O_SHARED + D_MODEL          # 32
_O_E_WI = _O_E_QKV + 3 * INNER          # 128
_O_D_QKV = _O_E_WI + D_FF               # 192
_O_C_QKV = _O_D_QKV + 3 * INNER         # 288
_O_D_WI = _O_C_QKV + 3 * INNER          # 384
_O_E_WO = _O_D_WI + D_FF                # 448
_O_D_WO = _O_E_WO + INNER               # 480
_O_C_WO = _O_D_WO + INNER               # 512
W32_COLS = _O_C_WO + INNER              # 544

# row indices inside the packed (8, D_MODEL) LayerNorm-weight slab
LN_E_SA, LN_E_FF, LN_E_FIN, LN_D_SA, LN_D_CA, LN_D_FF, LN_D_FIN = range(7)


# ----------------------------- fused Pallas kernel -----------------------------
def _codet5_kernel(onehot_ref, enc_add_ref, dec_add_ref, cross_add_ref,
                   eos_sel_ref, w32_ref, ffo_ref, ln_ref, out_ref):
    N = onehot_ref.shape[0] // 2        # TB * S stacked rows per grid step

    def mm(a, b):                       # 2-D matmul: bf16 MXU operands, f32 accumulate
        return jnp.dot(a.astype(jnp.bfloat16), b.astype(jnp.bfloat16),
                       preferred_element_type=jnp.float32)

    def bdot(a, b, dims):               # per-head batched matmul, f32 accumulate
        return lax.dot_general(a.astype(jnp.bfloat16), b.astype(jnp.bfloat16),
                               dims, preferred_element_type=jnp.float32)

    ln = ln_ref[...]                    # (8, D) f32, one vreg

    def rmsnorm(x, row):                # T5 LayerNorm: no mean subtraction, no bias
        var = jnp.mean(x * x, axis=-1, keepdims=True)
        return x * lax.rsqrt(var + EPS_LN) * ln[row:row + 1, :]

    def split_heads(x):                 # (N, INNER) -> (H, N, D_KV)
        return jnp.stack([x[:, h * D_KV:(h + 1) * D_KV] for h in range(N_HEADS)], axis=0)

    def mha(q_all, k_all, v_all, wo, add):
        # q/k/v: (N, INNER) f32; wo: (INNER, D) bf16 slab slice; add: (H,N,N) or (N,N) f32
        q, k, v = split_heads(q_all), split_heads(k_all), split_heads(v_all)
        s = bdot(q, k, (((2,), (2,)), ((0,), (0,)))) + add              # (H, N, N)
        s = s - jnp.max(s, axis=-1, keepdims=True)
        p = jnp.exp(s)
        p = p * pl.reciprocal(jnp.sum(p, axis=-1, keepdims=True), approx=True)
        ctx = bdot(p, v, (((2,), (1,)), ((0,), (0,))))                  # (H, N, D_KV)
        ctx = jnp.concatenate([ctx[h] for h in range(N_HEADS)], axis=-1)  # (N, INNER)
        return mm(ctx, wo)                                              # (N, D)

    # -------- embeddings: encoder + shifted-decoder ids in ONE one-hot matmul --------
    emb = mm(onehot_ref[...], w32_ref[:, _O_SHARED:_O_SHARED + D_MODEL])   # (2N, D)
    enc_h = emb[0:N, :]
    dec_h = emb[N:2 * N, :]

    # ---------------- encoder layer ----------------
    x = rmsnorm(enc_h, LN_E_SA)
    qkv = mm(x, w32_ref[:, _O_E_QKV:_O_E_QKV + 3 * INNER])                 # fused QKV
    enc_h = enc_h + mha(qkv[:, 0:INNER], qkv[:, INNER:2 * INNER], qkv[:, 2 * INNER:3 * INNER],
                        w32_ref[:, _O_E_WO:_O_E_WO + INNER], enc_add_ref[0])
    x = rmsnorm(enc_h, LN_E_FF)
    enc_h = enc_h + mm(jnp.maximum(mm(x, w32_ref[:, _O_E_WI:_O_E_WI + D_FF]), 0.0),
                       ffo_ref[:, 0:D_MODEL])
    enc_h = rmsnorm(enc_h, LN_E_FIN)

    # ---------------- decoder layer ----------------
    x = rmsnorm(dec_h, LN_D_SA)
    qkv = mm(x, w32_ref[:, _O_D_QKV:_O_D_QKV + 3 * INNER])
    dec_h = dec_h + mha(qkv[:, 0:INNER], qkv[:, INNER:2 * INNER], qkv[:, 2 * INNER:3 * INNER],
                        w32_ref[:, _O_D_WO:_O_D_WO + INNER], dec_add_ref[0])
    # cross-attention: q from decoder hidden, k/v from (final-normed) encoder output
    x = rmsnorm(dec_h, LN_D_CA)
    q = mm(x, w32_ref[:, _O_C_QKV:_O_C_QKV + INNER])
    kv = mm(enc_h, w32_ref[:, _O_C_QKV + INNER:_O_C_QKV + 3 * INNER])      # (N, 2*INNER)
    dec_h = dec_h + mha(q, kv[:, 0:INNER], kv[:, INNER:2 * INNER],
                        w32_ref[:, _O_C_WO:_O_C_WO + INNER], cross_add_ref[0])
    x = rmsnorm(dec_h, LN_D_FF)
    dec_h = dec_h + mm(jnp.maximum(mm(x, w32_ref[:, _O_D_WI:_O_D_WI + D_FF]), 0.0),
                       ffo_ref[:, D_MODEL:2 * D_MODEL])
    dec_h = rmsnorm(dec_h, LN_D_FIN)

    # -------- gather hidden state at last <eos> (f32) and L2-normalize (rsqrt on EUP) ------
    vec = jnp.dot(eos_sel_ref[0], dec_h, preferred_element_type=jnp.float32)  # (TB, D)
    ssq = jnp.sum(vec * vec, axis=-1, keepdims=True)
    out_ref[...] = vec * lax.rsqrt(jnp.maximum(ssq, 1e-24))   # == F.normalize(p=2, dim=1)


# ----------------------------- T5 glue (plain JAX preprocessing) -----------------------------
def _relative_position_bucket(relative_position, bidirectional, num_buckets, max_distance):
    ret = jnp.zeros_like(relative_position)
    if bidirectional:
        num_buckets //= 2
        ret = ret + (relative_position > 0).astype(jnp.int32) * num_buckets
        n = jnp.abs(relative_position)
    else:
        n = -jnp.minimum(relative_position, 0)
    max_exact = num_buckets // 2
    is_small = n < max_exact
    val_if_large = max_exact + (
        jnp.log(n.astype(jnp.float32) / max_exact + 1e-9)
        / np.log(max_distance / max_exact)
        * (num_buckets - max_exact)
    ).astype(jnp.int32)
    val_if_large = jnp.minimum(val_if_large, num_buckets - 1)
    return ret + jnp.where(is_small, n, val_if_large)


def _compute_rel_bias(s, rel_emb, bidirectional):
    ctx = jnp.arange(s)[:, None]
    mem = jnp.arange(s)[None, :]
    buckets = _relative_position_bucket(mem - ctx, bidirectional, NUM_BUCKETS, MAX_DISTANCE)
    values = rel_emb[buckets]                     # (S, S, H)
    return jnp.transpose(values, (2, 0, 1))       # (H, S, S)


def _shift_right(ids):
    start = jnp.full((ids.shape[0], 1), DEC_START_ID, ids.dtype)
    return jnp.concatenate([start, ids[:, :-1]], axis=1)


def model_forward_impl(params, source_ids):
    # Model.forward(code_inputs=source_ids) / (nl_inputs=source_ids): identical path.
    source_ids = source_ids.astype(jnp.int32)
    B, S = source_ids.shape

    TB = min(B, MAX_TB)                 # examples stacked per grid step
    n_tiles = -(-B // TB)
    B_pad = n_tiles * TB
    N = TB * S

    src = jnp.pad(source_ids, ((0, B_pad - B), (0, 0)))     # pad rows are all <pad>
    dec_ids = _shift_right(src)                              # labels == source_ids

    # fused encoder + decoder one-hot, tile-major row layout: [tile | enc/dec | TB*S rows]
    onehot = jnp.stack(
        [jax.nn.one_hot(src, VOCAB, dtype=jnp.float32).reshape(n_tiles, N, VOCAB),
         jax.nn.one_hot(dec_ids, VOCAB, dtype=jnp.float32).reshape(n_tiles, N, VOCAB)],
        axis=1,
    ).reshape(n_tiles * 2 * N, VOCAB)

    # ---- additive masks, per tile, block-diagonal over the TB stacked examples ----
    attn_mask = (src != PAD_ID).astype(jnp.float32)                 # (B_pad, S)
    keypad = ((1.0 - attn_mask) * NEG_INF).reshape(n_tiles, 1, N)   # broadcast over queries
    pos = jnp.arange(N)
    same_add = jnp.where((pos[:, None] // S) == (pos[None, :] // S), 0.0, NEG_INF)
    causal_add = jnp.where((pos[None, :] % S) <= (pos[:, None] % S), 0.0, NEG_INF)
    enc_mask = same_add[None] + keypad                              # (n_tiles, N, N)
    dec_mask = (same_add + causal_add)[None] + keypad               # decoder_attention_mask == src mask

    enc_bias = jnp.tile(_compute_rel_bias(S, params['enc_rel_bias'], True), (1, TB, TB))
    dec_bias = jnp.tile(_compute_rel_bias(S, params['dec_rel_bias'], False), (1, TB, TB))
    enc_add = enc_mask[:, None] + enc_bias[None]                    # (n_tiles, H, N, N)
    dec_add = dec_mask[:, None] + dec_bias[None]                    # (n_tiles, H, N, N)
    cross_add = enc_mask                                            # (n_tiles, N, N)

    # ---- one-hot selector for the LAST <eos> position of each example (zero row if none) ----
    positions = jnp.arange(S)
    last_eos = jnp.max(jnp.where(src == EOS_ID, positions[None, :], -1), axis=1)   # (B_pad,)
    col = jnp.where(last_eos >= 0, (jnp.arange(B_pad) % TB) * S + last_eos, -1)
    eos_sel = (jnp.arange(N)[None, :] == col[:, None]).astype(jnp.float32)
    eos_sel = eos_sel.reshape(n_tiles, TB, N)

    # ---- pack weights into three slabs (3 constant-index DMAs instead of ~20 tiny ones) ----
    e, d = params['enc_layer'], params['dec_layer']
    w32 = jnp.concatenate(
        [params['shared'], e['sa_wqkv'], e['ff_wi'], d['sa_wqkv'], d['ca_wqkv'],
         d['ff_wi'], e['sa_wo'], d['sa_wo'], d['ca_wo']], axis=1,
    ).astype(jnp.bfloat16)                                           # (32, 544)
    ffo = jnp.concatenate([e['ff_wo'], d['ff_wo']], axis=1).astype(jnp.bfloat16)   # (64, 64)
    ln_w = jnp.concatenate(
        [e['sa_ln'], e['ff_ln'], params['enc_final_ln'],
         d['sa_ln'], d['ca_ln'], d['ff_ln'], params['dec_final_ln'],
         jnp.ones((1, D_MODEL), jnp.float32)], axis=0)               # (8, 32) f32 (VPU side)

    H = N_HEADS
    const2 = lambda b: (0, 0)
    out = pl.pallas_call(
        _codet5_kernel,
        out_shape=jax.ShapeDtypeStruct((B_pad, D_MODEL), jnp.float32),
        grid=(n_tiles,),
        in_specs=[
            pl.BlockSpec((2 * N, VOCAB), lambda b: (b, 0)),          # fused enc+dec one-hot
            pl.BlockSpec((1, H, N, N), lambda b: (b, 0, 0, 0)),      # enc mask + rel bias
            pl.BlockSpec((1, H, N, N), lambda b: (b, 0, 0, 0)),      # dec mask + rel bias + causal
            pl.BlockSpec((1, N, N), lambda b: (b, 0, 0)),            # cross-attn mask
            pl.BlockSpec((1, TB, N), lambda b: (b, 0, 0)),           # last-<eos> selector
            pl.BlockSpec((D_MODEL, W32_COLS), const2),               # packed matmul weights (bf16)
            pl.BlockSpec((D_FF, 2 * D_MODEL), const2),               # packed FF output weights (bf16)
            pl.BlockSpec((8, D_MODEL), const2),                      # packed LayerNorm weights (f32)
        ],
        out_specs=pl.BlockSpec((TB, D_MODEL), lambda b: (b, 0)),
        compiler_params=pltpu.CompilerParams(dimension_semantics=("parallel",)),
    )(onehot, enc_add, dec_add, cross_add, eos_sel, w32, ffo, ln_w)

    return out[:B]


model_forward = jax.jit(model_forward_impl)


# ----------------------------- deterministic params -----------------------------
def init_params(key):
    keys = iter(jax.random.split(key, 32))

    def norm(shape, scale=0.02):
        return scale * jax.random.normal(next(keys), shape, jnp.float32)

    def attn_params(prefix):
        return {f'{prefix}_ln': jnp.ones((1, D_MODEL), jnp.float32),
                f'{prefix}_wqkv': norm((D_MODEL, 3 * INNER)),        # fused W_q|W_k|W_v
                f'{prefix}_wo': norm((INNER, D_MODEL))}

    def ff_params():
        return {'ff_ln': jnp.ones((1, D_MODEL), jnp.float32),
                'ff_wi': norm((D_MODEL, D_FF)),
                'ff_wo': norm((D_FF, D_MODEL))}

    return {
        'shared': norm((VOCAB, D_MODEL), 1.0),
        'enc_rel_bias': norm((NUM_BUCKETS, N_HEADS)),
        'dec_rel_bias': norm((NUM_BUCKETS, N_HEADS)),
        'enc_layer': {**attn_params('sa'), **ff_params()},
        'dec_layer': {**attn_params('sa'), **attn_params('ca'), **ff_params()},
        'enc_final_ln': jnp.ones((1, D_MODEL), jnp.float32),
        'dec_final_ln': jnp.ones((1, D_MODEL), jnp.float32),
    }


# ----------------------------- main -----------------------------
if __name__ == "__main__":
    key = jax.random.PRNGKey(0)
    params = init_params(key)

    B, S = 2, 8
    # pad = 0, eos = 2; both examples have the same number of <eos> tokens (2).
    source_ids = jnp.array([
        [5, 6, 7, 2, 9, 3, 2, 0],
        [4, 8, 2, 11, 2, 0, 0, 0],
    ], dtype=jnp.int32)

    # TODO(synk): the "same number of <eos> tokens" ValueError is a host-side check in
    # PyTorch; reproduced here eagerly (cannot raise from inside a TPU kernel).
    eos_counts = np.asarray((source_ids == EOS_ID).sum(axis=1))
    if len(np.unique(eos_counts)) > 1:
        raise ValueError('All examples must have the same number of <eos> tokens.')

    out = jax.block_until_ready(model_forward(params, source_ids))

    assert out.shape == (B, D_MODEL) and out.dtype == jnp.float32
    norms = np.asarray(jnp.linalg.norm(out, axis=1))
    assert np.allclose(norms, 1.0, atol=1e-3), norms
    print("KERNEL_OK")
</pallas_src>

<mosaic_0001>
module attributes {stable_mosaic.version = 11 : i64} {
  func.func @_codet5_kernel(%arg0: i32, %arg1: memref<32x32xf32, #tpu.memory_space<vmem>>, %arg2: memref<1x4x16x16xf32, #tpu.memory_space<vmem>>, %arg3: memref<1x4x16x16xf32, #tpu.memory_space<vmem>>, %arg4: memref<1x16x16xf32, #tpu.memory_space<vmem>>, %arg5: memref<1x2x16xf32, #tpu.memory_space<vmem>>, %arg6: memref<32x544xbf16, #tpu.memory_space<vmem>>, %arg7: memref<64x64xbf16, #tpu.memory_space<vmem>>, %arg8: memref<8x32xf32, #tpu.memory_space<vmem>>, %arg9: memref<2x32xf32, #tpu.memory_space<vmem>>) attributes {dimension_semantics = [#tpu.dimension_semantics<parallel>], iteration_bounds = array<i64: 1>, scalar_prefetch = 0 : i64, scratch_operands = 0 : i64, tpu.core_type = #tpu.core_type<tc>, window_params = [{transform_indices = @transform_0, window_bounds = array<i64: 32, 32>}, {transform_indices = @transform_1, window_bounds = array<i64: 1, 4, 16, 16>}, {transform_indices = @transform_2, window_bounds = array<i64: 1, 4, 16, 16>}, {transform_indices = @transform_3, window_bounds = array<i64: 1, 16, 16>}, {transform_indices = @transform_4, window_bounds = array<i64: 1, 2, 16>}, {pipeline_mode = #tpu.pipeline_mode<synchronous>, transform_indices = @transform_5, window_bounds = array<i64: 32, 544>}, {pipeline_mode = #tpu.pipeline_mode<synchronous>, transform_indices = @transform_6, window_bounds = array<i64: 64, 64>}, {pipeline_mode = #tpu.pipeline_mode<synchronous>, transform_indices = @transform_7, window_bounds = array<i64: 8, 32>}, {transform_indices = @transform_8, window_bounds = array<i64: 2, 32>}]} {
    %c0 = arith.constant 0 : index
    %c0_0 = arith.constant 0 : index
    %0 = vector.load %arg8[%c0, %c0_0] : memref<8x32xf32, #tpu.memory_space<vmem>>, vector<8x32xf32>
    %c0_1 = arith.constant 0 : index
    %c0_2 = arith.constant 0 : index
    %1 = vector.load %arg1[%c0_1, %c0_2] : memref<32x32xf32, #tpu.memory_space<vmem>>, vector<32x32xf32>
    %c0_3 = arith.constant 0 : index
    %c0_4 = arith.constant 0 : index
    %2 = vector.load %arg6[%c0_3, %c0_4] : memref<32x544xbf16, #tpu.memory_space<vmem>>, vector<32x32xbf16>
    %3 = arith.truncf %1 : vector<32x32xf32> to vector<32x32xbf16>
    %cst = arith.constant dense<0.000000e+00> : vector<32x32xf32>
    %4 = tpu.matmul %3, %2, %cst {dimension_numbers = #tpu.dot_dimension_numbers<[1], [0], [0], [1], [0, 0, 1, 1], [], []>} : vector<32x32xbf16>, vector<32x32xbf16>, vector<32x32xf32> -> vector<32x32xf32>
    %5 = vector.extract_strided_slice %4 {offsets = [0, 0], sizes = [16, 32], strides = [1, 1]} : vector<32x32xf32> to vector<16x32xf32>
    %6 = vector.extract_strided_slice %4 {offsets = [16, 0], sizes = [16, 32], strides = [1, 1]} : vector<32x32xf32> to vector<16x32xf32>
    %7 = arith.mulf %5, %5 : vector<16x32xf32>
    %cst_5 = arith.constant dense<0.000000e+00> : vector<16xf32>
    %8 = vector.multi_reduction <add>, %7, %cst_5 [1] : vector<16x32xf32> to vector<16xf32>
    %9 = vector.shape_cast %8 : vector<16xf32> to vector<16x1xf32>
    %cst_6 = arith.constant 3.200000e+01 : f32
    %10 = vector.broadcast %cst_6 : f32 to vector<16x1xf32>
    %11 = arith.divf %9, %10 : vector<16x1xf32>
    %cst_7 = arith.constant 9.99999997E-7 : f32
    %12 = vector.broadcast %cst_7 : f32 to vector<16x1xf32>
    %13 = arith.addf %11, %12 : vector<16x1xf32>
    %14 = math.rsqrt %13 : vector<16x1xf32>
    %15 = vector.broadcast %14 : vector<16x1xf32> to vector<16x32xf32>
    %16 = arith.mulf %5, %15 : vector<16x32xf32>
    %17 = vector.extract_strided_slice %0 {offsets = [0, 0], sizes = [1, 32], strides = [1, 1]} : vector<8x32xf32> to vector<1x32xf32>
    %18 = vector.broadcast %17 : vector<1x32xf32> to vector<16x32xf32>
    %19 = arith.mulf %16, %18 : vector<16x32xf32>
    %c0_8 = arith.constant 0 : index
    %c32 = arith.constant 32 : index
    %20 = vector.load %arg6[%c0_8, %c32] : memref<32x544xbf16, #tpu.memory_space<vmem>>, vector<32x96xbf16>
    %21 = arith.truncf %19 : vector<16x32xf32> to vector<16x32xbf16>
    %cst_9 = arith.constant dense<0.000000e+00> : vector<16x96xf32>
    %22 = tpu.matmul %21, %20, %cst_9 {dimension_numbers = #tpu.dot_dimension_numbers<[1], [0], [0], [1], [0, 0, 1, 1], [], []>} : vector<16x32xbf16>, vector<32x96xbf16>, vector<16x96xf32> -> vector<16x96xf32>
    %23 = vector.extract_strided_slice %22 {offsets = [0, 0], sizes = [16, 32], strides = [1, 1]} : vector<16x96xf32> to vector<16x32xf32>
    %24 = vector.extract_strided_slice %22 {offsets = [0, 32], sizes = [16, 32], strides = [1, 1]} : vector<16x96xf32> to vector<16x32xf32>
    %25 = vector.extract_strided_slice %22 {offsets = [0, 64], sizes = [16, 32], strides = [1, 1]} : vector<16x96xf32> to vector<16x32xf32>
    %c0_10 = arith.constant 0 : index
    %c448 = arith.constant 448 : index
    %26 = vector.load %arg6[%c0_10, %c448] : memref<32x544xbf16, #tpu.memory_space<vmem>>, vector<32x32xbf16>
    %c0_11 = arith.constant 0 : index
    %c0_12 = arith.constant 0 : index
    %c0_13 = arith.constant 0 : index
    %c0_14 = arith.constant 0 : index
    %27 = vector.load %arg2[%c0_11, %c0_12, %c0_13, %c0_14] : memref<1x4x16x16xf32, #tpu.memory_space<vmem>>, vector<1x4x16x16xf32>
    %28 = vector.shape_cast %27 : vector<1x4x16x16xf32> to vector<4x16x16xf32>
    %29 = vector.extract_strided_slice %23 {offsets = [0, 0], sizes = [16, 8], strides = [1, 1]} : vector<16x32xf32> to vector<16x8xf32>
    %30 = vector.extract_strided_slice %23 {offsets = [0, 8], sizes = [16, 8], strides = [1, 1]} : vector<16x32xf32> to vector<16x8xf32>
    %31 = vector.extract_strided_slice %23 {offsets = [0, 16], sizes = [16, 8], strides = [1, 1]} : vector<16x32xf32> to vector<16x8xf32>
    %32 = vector.extract_strided_slice %23 {offsets = [0, 24], sizes = [16, 8], strides = [1, 1]} : vector<16x32xf32> to vector<16x8xf32>
    %33 = vector.shape_cast %29 : vector<16x8xf32> to vector<1x16x8xf32>
    %34 = vector.shape_cast %30 : vector<16x8xf32> to vector<1x16x8xf32>
    %35 = vector.shape_cast %31 : vector<16x8xf32> to vector<1x16x8xf32>
    %36 = vector.shape_cast %32 : vector<16x8xf32> to vector<1x16x8xf32>
    %37 = tpu.concatenate %33, %34, %35, %36 in 0 : vector<1x16x8xf32>, vector<1x16x8xf32>, vector<1x16x8xf32>, vector<1x16x8xf32> -> vector<4x16x8xf32>
    %38 = vector.extract_strided_slice %24 {offsets = [0, 0], sizes = [16, 8], strides = [1, 1]} : vector<16x32xf32> to vector<16x8xf32>
    %39 = vector.extract_strided_slice %24 {offsets = [0, 8], sizes = [16, 8], strides = [1, 1]} : vector<16x32xf32> to vector<16x8xf32>
    %40 = vector.extract_strided_slice %24 {offsets = [0, 16], sizes = [16, 8], strides = [1, 1]} : vector<16x32xf32> to vector<16x8xf32>
    %41 = vector.extract_strided_slice %24 {offsets = [0, 24], sizes = [16, 8], strides = [1, 1]} : vector<16x32xf32> to vector<16x8xf32>
    %42 = vector.shape_cast %38 : vector<16x8xf32> to vector<1x16x8xf32>
    %43 = vector.shape_cast %39 : vector<16x8xf32> to vector<1x16x8xf32>
    %44 = vector.shape_cast %40 : vector<16x8xf32> to vector<1x16x8xf32>
    %45 = vector.shape_cast %41 : vector<16x8xf32> to vector<1x16x8xf32>
    %46 = tpu.concatenate %42, %43, %44, %45 in 0 : vector<1x16x8xf32>, vector<1x16x8xf32>, vector<1x16x8xf32>, vector<1x16x8xf32> -> vector<4x16x8xf32>
    %47 = vector.extract_strided_slice %25 {offsets = [0, 0], sizes = [16, 8], strides = [1, 1]} : vector<16x32xf32> to vector<16x8xf32>
    %48 = vector.extract_strided_slice %25 {offsets = [0, 8], sizes = [16, 8], strides = [1, 1]} : vector<16x32xf32> to vector<16x8xf32>
    %49 = vector.extract_strided_slice %25 {offsets = [0, 16], sizes = [16, 8], strides = [1, 1]} : vector<16x32xf32> to vector<16x8xf32>
    %50 = vector.extract_strided_slice %25 {offsets = [0, 24], sizes = [16, 8], strides = [1, 1]} : vector<16x32xf32> to vector<16x8xf32>
    %51 = vector.shape_cast %47 : vector<16x8xf32> to vector<1x16x8xf32>
    %52 = vector.shape_cast %48 : vector<16x8xf32> to vector<1x16x8xf32>
    %53 = vector.shape_cast %49 : vector<16x8xf32> to vector<1x16x8xf32>
    %54 = vector.shape_cast %50 : vector<16x8xf32> to vector<1x16x8xf32>
    %55 = tpu.concatenate %51, %52, %53, %54 in 0 : vector<1x16x8xf32>, vector<1x16x8xf32>, vector<1x16x8xf32>, vector<1x16x8xf32> -> vector<4x16x8xf32>
    %56 = arith.truncf %37 : vector<4x16x8xf32> to vector<4x16x8xbf16>
    %57 = arith.truncf %46 : vector<4x16x8xf32> to vector<4x16x8xbf16>
    %cst_15 = arith.constant dense<0.000000e+00> : vector<4x16x16xf32>
    %58 = tpu.matmul %56, %57, %cst_15 {dimension_numbers = #tpu.dot_dimension_numbers<[2], [2], [1], [1], [0, 0, 0, 1, 1, 1], [0], [0]>} : vector<4x16x8xbf16>, vector<4x16x8xbf16>, vector<4x16x16xf32> -> vector<4x16x16xf32>
    %59 = arith.addf %58, %28 : vector<4x16x16xf32>
    %cst_16 = arith.constant dense<0xFF800000> : vector<4x16xf32>
    %60 = vector.multi_reduction <maximumf>, %59, %cst_16 [2] : vector<4x16x16xf32> to vector<4x16xf32>
    %61 = vector.shape_cast %60 : vector<4x16xf32> to vector<4x16x1xf32>
    %62 = vector.broadcast %61 : vector<4x16x1xf32> to vector<4x16x16xf32>
    %63 = arith.subf %59, %62 : vector<4x16x16xf32>
    %64 = math.exp %63 : vector<4x16x16xf32>
    %cst_17 = arith.constant dense<0.000000e+00> : vector<4x16xf32>
    %65 = vector.multi_reduction <add>, %64, %cst_17 [2] : vector<4x16x16xf32> to vector<4x16xf32>
    %66 = vector.shape_cast %65 : vector<4x16xf32> to vector<4x16x1xf32>
    %67 = tpu.reciprocal %66 {approx = true} : vector<4x16x1xf32> -> vector<4x16x1xf32>
    %68 = vector.broadcast %67 : vector<4x16x1xf32> to vector<4x16x16xf32>
    %69 = arith.mulf %64, %68 : vector<4x16x16xf32>
    %70 = arith.truncf %69 : vector<4x16x16xf32> to vector<4x16x16xbf16>
    %71 = arith.truncf %55 : vector<4x16x8xf32> to vector<4x16x8xbf16>
    %cst_18 = arith.constant dense<0.000000e+00> : vector<4x16x8xf32>
    %72 = tpu.matmul %70, %71, %cst_18 {dimension_numbers = #tpu.dot_dimension_numbers<[2], [1], [1], [2], [0, 0, 0, 1, 1, 2], [0], [0]>} : vector<4x16x16xbf16>, vector<4x16x8xbf16>, vector<4x16x8xf32> -> vector<4x16x8xf32>
    %73 = vector.extract_strided_slice %72 {offsets = [0, 0, 0], sizes = [1, 16, 8], strides = [1, 1, 1]} : vector<4x16x8xf32> to vector<1x16x8xf32>
    %74 = vector.shape_cast %73 : vector<1x16x8xf32> to vector<16x8xf32>
    %75 = vector.extract_strided_slice %72 {offsets = [1, 0, 0], sizes = [1, 16, 8], strides = [1, 1, 1]} : vector<4x16x8xf32> to vector<1x16x8xf32>
    %76 = vector.shape_cast %75 : vector<1x16x8xf32> to vector<16x8xf32>
    %77 = vector.extract_strided_slice %72 {offsets = [2, 0, 0], sizes = [1, 16, 8], strides = [1, 1, 1]} : vector<4x16x8xf32> to vector<1x16x8xf32>
    %78 = vector.shape_cast %77 : vector<1x16x8xf32> to vector<16x8xf32>
    %79 = vector.extract_strided_slice %72 {offsets = [3, 0, 0], sizes = [1, 16, 8], strides = [1, 1, 1]} : vector<4x16x8xf32> to vector<1x16x8xf32>
    %80 = vector.shape_cast %79 : vector<1x16x8xf32> to vector<16x8xf32>
    %81 = tpu.concatenate %74, %76, %78, %80 in 1 : vector<16x8xf32>, vector<16x8xf32>, vector<16x8xf32>, vector<16x8xf32> -> vector<16x32xf32>
    %82 = arith.truncf %81 : vector<16x32xf32> to vector<16x32xbf16>
    %cst_19 = arith.constant dense<0.000000e+00> : vector<16x32xf32>
    %83 = tpu.matmul %82, %26, %cst_19 {dimension_numbers = #tpu.dot_dimension_numbers<[1], [0], [0], [1], [0, 0, 1, 1], [], []>} : vector<16x32xbf16>, vector<32x32xbf16>, vector<16x32xf32> -> vector<16x32xf32>
    %84 = arith.addf %5, %83 : vector<16x32xf32>
    %85 = arith.mulf %84, %84 : vector<16x32xf32>
    %cst_20 = arith.constant dense<0.000000e+00> : vector<16xf32>
    %86 = vector.multi_reduction <add>, %85, %cst_20 [1] : vector<16x32xf32> to vector<16xf32>
    %87 = vector.shape_cast %86 : vector<16xf32> to vector<16x1xf32>
    %cst_21 = arith.constant 3.200000e+01 : f32
    %88 = vector.broadcast %cst_21 : f32 to vector<16x1xf32>
    %89 = arith.divf %87, %88 : vector<16x1xf32>
    %cst_22 = arith.constant 9.99999997E-7 : f32
    %90 = vector.broadcast %cst_22 : f32 to vector<16x1xf32>
    %91 = arith.addf %89, %90 : vector<16x1xf32>
    %92 = math.rsqrt %91 : vector<16x1xf32>
    %93 = vector.broadcast %92 : vector<16x1xf32> to vector<16x32xf32>
    %94 = arith.mulf %84, %93 : vector<16x32xf32>
    %95 = vector.extract_strided_slice %0 {offsets = [1, 0], sizes = [1, 32], strides = [1, 1]} : vector<8x32xf32> to vector<1x32xf32>
    %96 = vector.broadcast %95 : vector<1x32xf32> to vector<16x32xf32>
    %97 = arith.mulf %94, %96 : vector<16x32xf32>
    %c0_23 = arith.constant 0 : index
    %c128 = arith.constant 128 : index
    %98 = vector.load %arg6[%c0_23, %c128] : memref<32x544xbf16, #tpu.memory_space<vmem>>, vector<32x64xbf16>
    %99 = arith.truncf %97 : vector<16x32xf32> to vector<16x32xbf16>
    %cst_24 = arith.constant dense<0.000000e+00> : vector<16x64xf32>
    %100 = tpu.matmul %99, %98, %cst_24 {dimension_numbers = #tpu.dot_dimension_numbers<[1], [0], [0], [1], [0, 0, 1, 1], [], []>} : vector<16x32xbf16>, vector<32x64xbf16>, vector<16x64xf32> -> vector<16x64xf32>
    %cst_25 = arith.constant 0.000000e+00 : f32
    %101 = vector.broadcast %cst_25 : f32 to vector<16x64xf32>
    %102 = arith.maximumf %100, %101 : vector<16x64xf32>
    %c0_26 = arith.constant 0 : index
    %c0_27 = arith.constant 0 : index
    %103 = vector.load %arg7[%c0_26, %c0_27] : memref<64x64xbf16, #tpu.memory_space<vmem>>, vector<64x32xbf16>
    %104 = arith.truncf %102 : vector<16x64xf32> to vector<16x64xbf16>
    %cst_28 = arith.constant dense<0.000000e+00> : vector<16x32xf32>
    %105 = tpu.matmul %104, %103, %cst_28 {dimension_numbers = #tpu.dot_dimension_numbers<[1], [0], [0], [1], [0, 0, 1, 1], [], []>} : vector<16x64xbf16>, vector<64x32xbf16>, vector<16x32xf32> -> vector<16x32xf32>
    %106 = arith.addf %84, %105 : vector<16x32xf32>
    %107 = arith.mulf %106, %106 : vector<16x32xf32>
    %cst_29 = arith.constant dense<0.000000e+00> : vector<16xf32>
    %108 = vector.multi_reduction <add>, %107, %cst_29 [1] : vector<16x32xf32> to vector<16xf32>
    %109 = vector.shape_cast %108 : vector<16xf32> to vector<16x1xf32>
    %cst_30 = arith.constant 3.200000e+01 : f32
    %110 = vector.broadcast %cst_30 : f32 to vector<16x1xf32>
    %111 = arith.divf %109, %110 : vector<16x1xf32>
    %cst_31 = arith.constant 9.99999997E-7 : f32
    %112 = vector.broadcast %cst_31 : f32 to vector<16x1xf32>
    %113 = arith.addf %111, %112 : vector<16x1xf32>
    %114 = math.rsqrt %113 : vector<16x1xf32>
    %115 = vector.broadcast %114 : vector<16x1xf32> to vector<16x32xf32>
    %116 = arith.mulf %106, %115 : vector<16x32xf32>
    %117 = vector.extract_strided_slice %0 {offsets = [2, 0], sizes = [1, 32], strides = [1, 1]} : vector<8x32xf32> to vector<1x32xf32>
    %118 = vector.broadcast %117 : vector<1x32xf32> to vector<16x32xf32>
    %119 = arith.mulf %116, %118 : vector<16x32xf32>
    %120 = arith.mulf %6, %6 : vector<16x32xf32>
    %cst_32 = arith.constant dense<0.000000e+00> : vector<16xf32>
    %121 = vector.multi_reduction <add>, %120, %cst_32 [1] : vector<16x32xf32> to vector<16xf32>
    %122 = vector.shape_cast %121 : vector<16xf32> to vector<16x1xf32>
    %cst_33 = arith.constant 3.200000e+01 : f32
    %123 = vector.broadcast %cst_33 : f32 to vector<16x1xf32>
    %124 = arith.divf %122, %123 : vector<16x1xf32>
    %cst_34 = arith.constant 9.99999997E-7 : f32
    %125 = vector.broadcast %cst_34 : f32 to vector<16x1xf32>
    %126 = arith.addf %124, %125 : vector<16x1xf32>
    %127 = math.rsqrt %126 : vector<16x1xf32>
    %128 = vector.broadcast %127 : vector<16x1xf32> to vector<16x32xf32>
    %129 = arith.mulf %6, %128 : vector<16x32xf32>
    %130 = vector.extract_strided_slice %0 {offsets = [3, 0], sizes = [1, 32], strides = [1, 1]} : vector<8x32xf32> to vector<1x32xf32>
    %131 = vector.broadcast %130 : vector<1x32xf32> to vector<16x32xf32>
    %132 = arith.mulf %129, %131 : vector<16x32xf32>
    %c0_35 = arith.constant 0 : index
    %c192 = arith.constant 192 : index
    %133 = vector.load %arg6[%c0_35, %c192] : memref<32x544xbf16, #tpu.memory_space<vmem>>, vector<32x96xbf16>
    %134 = arith.truncf %132 : vector<16x32xf32> to vector<16x32xbf16>
    %cst_36 = arith.constant dense<0.000000e+00> : vector<16x96xf32>
    %135 = tpu.matmul %134, %133, %cst_36 {dimension_numbers = #tpu.dot_dimension_numbers<[1], [0], [0], [1], [0, 0, 1, 1], [], []>} : vector<16x32xbf16>, vector<32x96xbf16>, vector<16x96xf32> -> vector<16x96xf32>
    %136 = vector.extract_strided_slice %135 {offsets = [0, 0], sizes = [16, 32], strides = [1, 1]} : vector<16x96xf32> to vector<16x32xf32>
    %137 = vector.extract_strided_slice %135 {offsets = [0, 32], sizes = [16, 32], strides = [1, 1]} : vector<16x96xf32> to vector<16x32xf32>
    %138 = vector.extract_strided_slice %135 {offsets = [0, 64], sizes = [16, 32], strides = [1, 1]} : vector<16x96xf32> to vector<16x32xf32>
    %c0_37 = arith.constant 0 : index
    %c480 = arith.constant 480 : index
    %139 = vector.load %arg6[%c0_37, %c480] : memref<32x544xbf16, #tpu.memory_space<vmem>>, vector<32x32xbf16>
    %c0_38 = arith.constant 0 : index
    %c0_39 = arith.constant 0 : index
    %c0_40 = arith.constant 0 : index
    %c0_41 = arith.constant 0 : index
    %140 = vector.load %arg3[%c0_38, %c0_39, %c0_40, %c0_41] : memref<1x4x16x16xf32, #tpu.memory_space<vmem>>, vector<1x4x16x16xf32>
    %141 = vector.shape_cast %140 : vector<1x4x16x16xf32> to vector<4x16x16xf32>
    %142 = vector.extract_strided_slice %136 {offsets = [0, 0], sizes = [16, 8], strides = [1, 1]} : vector<16x32xf32> to vector<16x8xf32>
    %143 = vector.extract_strided_slice %136 {offsets = [0, 8], sizes = [16, 8], strides = [1, 1]} : vector<16x32xf32> to vector<16x8xf32>
    %144 = vector.extract_strided_slice %136 {offsets = [0, 16], sizes = [16, 8], strides = [1, 1]} : vector<16x32xf32> to vector<16x8xf32>
    %145 = vector.extract_strided_slice %136 {offsets = [0, 24], sizes = [16, 8], strides = [1, 1]} : vector<16x32xf32> to vector<16x8xf32>
    %146 = vector.shape_cast %142 : vector<16x8xf32> to vector<1x16x8xf32>
    %147 = vector.shape_cast %143 : vector<16x8xf32> to vector<1x16x8xf32>
    %148 = vector.shape_cast %144 : vector<16x8xf32> to vector<1x16x8xf32>
    %149 = vector.shape_cast %145 : vector<16x8xf32> to vector<1x16x8xf32>
    %150 = tpu.concatenate %146, %147, %148, %149 in 0 : vector<1x16x8xf32>, vector<1x16x8xf32>, vector<1x16x8xf32>, vector<1x16x8xf32> -> vector<4x16x8xf32>
    %151 = vector.extract_strided_slice %137 {offsets = [0, 0], sizes = [16, 8], strides = [1, 1]} : vector<16x32xf32> to vector<16x8xf32>
    %152 = vector.extract_strided_slice %137 {offsets = [0, 8], sizes = [16, 8], strides = [1, 1]} : vector<16x32xf32> to vector<16x8xf32>
    %153 = vector.extract_strided_slice %137 {offsets = [0, 16], sizes = [16, 8], strides = [1, 1]} : vector<16x32xf32> to vector<16x8xf32>
    %154 = vector.extract_strided_slice %137 {offsets = [0, 24], sizes = [16, 8], strides = [1, 1]} : vector<16x32xf32> to vector<16x8xf32>
    %155 = vector.shape_cast %151 : vector<16x8xf32> to vector<1x16x8xf32>
    %156 = vector.shape_cast %152 : vector<16x8xf32> to vector<1x16x8xf32>
    %157 = vector.shape_cast %153 : vector<16x8xf32> to vector<1x16x8xf32>
    %158 = vector.shape_cast %154 : vector<16x8xf32> to vector<1x16x8xf32>
    %159 = tpu.concatenate %155, %156, %157, %158 in 0 : vector<1x16x8xf32>, vector<1x16x8xf32>, vector<1x16x8xf32>, vector<1x16x8xf32> -> vector<4x16x8xf32>
    %160 = vector.extract_strided_slice %138 {offsets = [0, 0], sizes = [16, 8], strides = [1, 1]} : vector<16x32xf32> to vector<16x8xf32>
    %161 = vector.extract_strided_slice %138 {offsets = [0, 8], sizes = [16, 8], strides = [1, 1]} : vector<16x32xf32> to vector<16x8xf32>
    %162 = vector.extract_strided_slice %138 {offsets = [0, 16], sizes = [16, 8], strides = [1, 1]} : vector<16x32xf32> to vector<16x8xf32>
    %163 = vector.extract_strided_slice %138 {offsets = [0, 24], sizes = [16, 8], strides = [1, 1]} : vector<16x32xf32> to vector<16x8xf32>
    %164 = vector.shape_cast %160 : vector<16x8xf32> to vector<1x16x8xf32>
    %165 = vector.shape_cast %161 : vector<16x8xf32> to vector<1x16x8xf32>
    %166 = vector.shape_cast %162 : vector<16x8xf32> to vector<1x16x8xf32>
    %167 = vector.shape_cast %163 : vector<16x8xf32> to vector<1x16x8xf32>
    %168 = tpu.concatenate %164, %165, %166, %167 in 0 : vector<1x16x8xf32>, vector<1x16x8xf32>, vector<1x16x8xf32>, vector<1x16x8xf32> -> vector<4x16x8xf32>
    %169 = arith.truncf %150 : vector<4x16x8xf32> to vector<4x16x8xbf16>
    %170 = arith.truncf %159 : vector<4x16x8xf32> to vector<4x16x8xbf16>
    %cst_42 = arith.constant dense<0.000000e+00> : vector<4x16x16xf32>
    %171 = tpu.matmul %169, %170, %cst_42 {dimension_numbers = #tpu.dot_dimension_numbers<[2], [2], [1], [1], [0, 0, 0, 1, 1, 1], [0], [0]>} : vector<4x16x8xbf16>, vector<4x16x8xbf16>, vector<4x16x16xf32> -> vector<4x16x16xf32>
    %172 = arith.addf %171, %141 : vector<4x16x16xf32>
    %cst_43 = arith.constant dense<0xFF800000> : vector<4x16xf32>
    %173 = vector.multi_reduction <maximumf>, %172, %cst_43 [2] : vector<4x16x16xf32> to vector<4x16xf32>
    %174 = vector.shape_cast %173 : vector<4x16xf32> to vector<4x16x1xf32>
    %175 = vector.broadcast %174 : vector<4x16x1xf32> to vector<4x16x16xf32>
    %176 = arith.subf %172, %175 : vector<4x16x16xf32>
    %177 = math.exp %176 : vector<4x16x16xf32>
    %cst_44 = arith.constant dense<0.000000e+00> : vector<4x16xf32>
    %178 = vector.multi_reduction <add>, %177, %cst_44 [2] : vector<4x16x16xf32> to vector<4x16xf32>
    %179 = vector.shape_cast %178 : vector<4x16xf32> to vector<4x16x1xf32>
    %180 = tpu.reciprocal %179 {approx = true} : vector<4x16x1xf32> -> vector<4x16x1xf32>
    %181 = vector.broadcast %180 : vector<4x16x1xf32> to vector<4x16x16xf32>
    %182 = arith.mulf %177, %181 : vector<4x16x16xf32>
    %183 = arith.truncf %182 : vector<4x16x16xf32> to vector<4x16x16xbf16>
    %184 = arith.truncf %168 : vector<4x16x8xf32> to vector<4x16x8xbf16>
    %cst_45 = arith.constant dense<0.000000e+00> : vector<4x16x8xf32>
    %185 = tpu.matmul %183, %184, %cst_45 {dimension_numbers = #tpu.dot_dimension_numbers<[2], [1], [1], [2], [0, 0, 0, 1, 1, 2], [0], [0]>} : vector<4x16x16xbf16>, vector<4x16x8xbf16>, vector<4x16x8xf32> -> vector<4x16x8xf32>
    %186 = vector.extract_strided_slice %185 {offsets = [0, 0, 0], sizes = [1, 16, 8], strides = [1, 1, 1]} : vector<4x16x8xf32> to vector<1x16x8xf32>
    %187 = vector.shape_cast %186 : vector<1x16x8xf32> to vector<16x8xf32>
    %188 = vector.extract_strided_slice %185 {offsets = [1, 0, 0], sizes = [1, 16, 8], strides = [1, 1, 1]} : vector<4x16x8xf32> to vector<1x16x8xf32>
    %189 = vector.shape_cast %188 : vector<1x16x8xf32> to vector<16x8xf32>
    %190 = vector.extract_strided_slice %185 {offsets = [2, 0, 0], sizes = [1, 16, 8], strides = [1, 1, 1]} : vector<4x16x8xf32> to vector<1x16x8xf32>
    %191 = vector.shape_cast %190 : vector<1x16x8xf32> to vector<16x8xf32>
    %192 = vector.extract_strided_slice %185 {offsets = [3, 0, 0], sizes = [1, 16, 8], strides = [1, 1, 1]} : vector<4x16x8xf32> to vector<1x16x8xf32>
    %193 = vector.shape_cast %192 : vector<1x16x8xf32> to vector<16x8xf32>
    %194 = tpu.concatenate %187, %189, %191, %193 in 1 : vector<16x8xf32>, vector<16x8xf32>, vector<16x8xf32>, vector<16x8xf32> -> vector<16x32xf32>
    %195 = arith.truncf %194 : vector<16x32xf32> to vector<16x32xbf16>
    %cst_46 = arith.constant dense<0.000000e+00> : vector<16x32xf32>
    %196 = tpu.matmul %195, %139, %cst_46 {dimension_numbers = #tpu.dot_dimension_numbers<[1], [0], [0], [1], [0, 0, 1, 1], [], []>} : vector<16x32xbf16>, vector<32x32xbf16>, vector<16x32xf32> -> vector<16x32xf32>
    %197 = arith.addf %6, %196 : vector<16x32xf32>
    %198 = arith.mulf %197, %197 : vector<16x32xf32>
    %cst_47 = arith.constant dense<0.000000e+00> : vector<16xf32>
    %199 = vector.multi_reduction <add>, %198, %cst_47 [1] : vector<16x32xf32> to vector<16xf32>
    %200 = vector.shape_cast %199 : vector<16xf32> to vector<16x1xf32>
    %cst_48 = arith.constant 3.200000e+01 : f32
    %201 = vector.broadcast %cst_48 : f32 to vector<16x1xf32>
    %202 = arith.divf %200, %201 : vector<16x1xf32>
    %cst_49 = arith.constant 9.99999997E-7 : f32
    %203 = vector.broadcast %cst_49 : f32 to vector<16x1xf32>
    %204 = arith.addf %202, %203 : vector<16x1xf32>
    %205 = math.rsqrt %204 : vector<16x1xf32>
    %206 = vector.broadcast %205 : vector<16x1xf32> to vector<16x32xf32>
    %207 = arith.mulf %197, %206 : vector<16x32xf32>
    %208 = vector.extract_strided_slice %0 {offsets = [4, 0], sizes = [1, 32], strides = [1, 1]} : vector<8x32xf32> to vector<1x32xf32>
    %209 = vector.broadcast %208 : vector<1x32xf32> to vector<16x32xf32>
    %210 = arith.mulf %207, %209 : vector<16x32xf32>
    %c0_50 = arith.constant 0 : index
    %c288 = arith.constant 288 : index
    %211 = vector.load %arg6[%c0_50, %c288] : memref<32x544xbf16, #tpu.memory_space<vmem>>, vector<32x32xbf16>
    %212 = arith.truncf %210 : vector<16x32xf32> to vector<16x32xbf16>
    %cst_51 = arith.constant dense<0.000000e+00> : vector<16x32xf32>
    %213 = tpu.matmul %212, %211, %cst_51 {dimension_numbers = #tpu.dot_dimension_numbers<[1], [0], [0], [1], [0, 0, 1, 1], [], []>} : vector<16x32xbf16>, vector<32x32xbf16>, vector<16x32xf32> -> vector<16x32xf32>
    %c0_52 = arith.constant 0 : index
    %c320 = arith.constant 320 : index
    %214 = vector.load %arg6[%c0_52, %c320] : memref<32x544xbf16, #tpu.memory_space<vmem>>, vector<32x64xbf16>
    %215 = arith.truncf %119 : vector<16x32xf32> to vector<16x32xbf16>
    %cst_53 = arith.constant dense<0.000000e+00> : vector<16x64xf32>
    %216 = tpu.matmul %215, %214, %cst_53 {dimension_numbers = #tpu.dot_dimension_numbers<[1], [0], [0], [1], [0, 0, 1, 1], [], []>} : vector<16x32xbf16>, vector<32x64xbf16>, vector<16x64xf32> -> vector<16x64xf32>
    %217 = vector.extract_strided_slice %216 {offsets = [0, 0], sizes = [16, 32], strides = [1, 1]} : vector<16x64xf32> to vector<16x32xf32>
    %218 = vector.extract_strided_slice %216 {offsets = [0, 32], sizes = [16, 32], strides = [1, 1]} : vector<16x64xf32> to vector<16x32xf32>
    %c0_54 = arith.constant 0 : index
    %c512 = arith.constant 512 : index
    %219 = vector.load %arg6[%c0_54, %c512] : memref<32x544xbf16, #tpu.memory_space<vmem>>, vector<32x32xbf16>
    %c0_55 = arith.constant 0 : index
    %c0_56 = arith.constant 0 : index
    %c0_57 = arith.constant 0 : index
    %220 = vector.load %arg4[%c0_55, %c0_56, %c0_57] : memref<1x16x16xf32, #tpu.memory_space<vmem>>, vector<1x16x16xf32>
    %221 = vector.shape_cast %220 : vector<1x16x16xf32> to vector<16x16xf32>
    %222 = vector.extract_strided_slice %213 {offsets = [0, 0], sizes = [16, 8], strides = [1, 1]} : vector<16x32xf32> to vector<16x8xf32>
    %223 = vector.extract_strided_slice %213 {offsets = [0, 8], sizes = [16, 8], strides = [1, 1]} : vector<16x32xf32> to vector<16x8xf32>
    %224 = vector.extract_strided_slice %213 {offsets = [0, 16], sizes = [16, 8], strides = [1, 1]} : vector<16x32xf32> to vector<16x8xf32>
    %225 = vector.extract_strided_slice %213 {offsets = [0, 24], sizes = [16, 8], strides = [1, 1]} : vector<16x32xf32> to vector<16x8xf32>
    %226 = vector.shape_cast %222 : vector<16x8xf32> to vector<1x16x8xf32>
    %227 = vector.shape_cast %223 : vector<16x8xf32> to vector<1x16x8xf32>
    %228 = vector.shape_cast %224 : vector<16x8xf32> to vector<1x16x8xf32>
    %229 = vector.shape_cast %225 : vector<16x8xf32> to vector<1x16x8xf32>
    %230 = tpu.concatenate %226, %227, %228, %229 in 0 : vector<1x16x8xf32>, vector<1x16x8xf32>, vector<1x16x8xf32>, vector<1x16x8xf32> -> vector<4x16x8xf32>
    %231 = vector.extract_strided_slice %217 {offsets = [0, 0], sizes = [16, 8], strides = [1, 1]} : vector<16x32xf32> to vector<16x8xf32>
    %232 = vector.extract_strided_slice %217 {offsets = [0, 8], sizes = [16, 8], strides = [1, 1]} : vector<16x32xf32> to vector<16x8xf32>
    %233 = vector.extract_strided_slice %217 {offsets = [0, 16], sizes = [16, 8], strides = [1, 1]} : vector<16x32xf32> to vector<16x8xf32>
    %234 = vector.extract_strided_slice %217 {offsets = [0, 24], sizes = [16, 8], strides = [1, 1]} : vector<16x32xf32> to vector<16x8xf32>
    %235 = vector.shape_cast %231 : vector<16x8xf32> to vector<1x16x8xf32>
    %236 = vector.shape_cast %232 : vector<16x8xf32> to vector<1x16x8xf32>
    %237 = vector.shape_cast %233 : vector<16x8xf32> to vector<1x16x8xf32>
    %238 = vector.shape_cast %234 : vector<16x8xf32> to vector<1x16x8xf32>
    %239 = tpu.concatenate %235, %236, %237, %238 in 0 : vector<1x16x8xf32>, vector<1x16x8xf32>, vector<1x16x8xf32>, vector<1x16x8xf32> -> vector<4x16x8xf32>
    %240 = vector.extract_strided_slice %218 {offsets = [0, 0], sizes = [16, 8], strides = [1, 1]} : vector<16x32xf32> to vector<16x8xf32>
    %241 = vector.extract_strided_slice %218 {offsets = [0, 8], sizes = [16, 8], strides = [1, 1]} : vector<16x32xf32> to vector<16x8xf32>
    %242 = vector.extract_strided_slice %218 {offsets = [0, 16], sizes = [16, 8], strides = [1, 1]} : vector<16x32xf32> to vector<16x8xf32>
    %243 = vector.extract_strided_slice %218 {offsets = [0, 24], sizes = [16, 8], strides = [1, 1]} : vector<16x32xf32> to vector<16x8xf32>
    %244 = vector.shape_cast %240 : vector<16x8xf32> to vector<1x16x8xf32>
    %245 = vector.shape_cast %241 : vector<16x8xf32> to vector<1x16x8xf32>
    %246 = vector.shape_cast %242 : vector<16x8xf32> to vector<1x16x8xf32>
    %247 = vector.shape_cast %243 : vector<16x8xf32> to vector<1x16x8xf32>
    %248 = tpu.concatenate %244, %245, %246, %247 in 0 : vector<1x16x8xf32>, vector<1x16x8xf32>, vector<1x16x8xf32>, vector<1x16x8xf32> -> vector<4x16x8xf32>
    %249 = arith.truncf %230 : vector<4x16x8xf32> to vector<4x16x8xbf16>
    %250 = arith.truncf %239 : vector<4x16x8xf32> to vector<4x16x8xbf16>
    %cst_58 = arith.constant dense<0.000000e+00> : vector<4x16x16xf32>
    %251 = tpu.matmul %249, %250, %cst_58 {dimension_numbers = #tpu.dot_dimension_numbers<[2], [2], [1], [1], [0, 0, 0, 1, 1, 1], [0], [0]>} : vector<4x16x8xbf16>, vector<4x16x8xbf16>, vector<4x16x16xf32> -> vector<4x16x16xf32>
    %252 = vector.shape_cast %221 : vector<16x16xf32> to vector<1x16x16xf32>
    %253 = vector.broadcast %252 : vector<1x16x16xf32> to vector<4x16x16xf32>
    %254 = arith.addf %251, %253 : vector<4x16x16xf32>
    %cst_59 = arith.constant dense<0xFF800000> : vector<4x16xf32>
    %255 = vector.multi_reduction <maximumf>, %254, %cst_59 [2] : vector<4x16x16xf32> to vector<4x16xf32>
    %256 = vector.shape_cast %255 : vector<4x16xf32> to vector<4x16x1xf32>
    %257 = vector.broadcast %256 : vector<4x16x1xf32> to vector<4x16x16xf32>
    %258 = arith.subf %254, %257 : vector<4x16x16xf32>
    %259 = math.exp %258 : vector<4x16x16xf32>
    %cst_60 = arith.constant dense<0.000000e+00> : vector<4x16xf32>
    %260 = vector.multi_reduction <add>, %259, %cst_60 [2] : vector<4x16x16xf32> to vector<4x16xf32>
    %261 = vector.shape_cast %260 : vector<4x16xf32> to vector<4x16x1xf32>
    %262 = tpu.reciprocal %261 {approx = true} : vector<4x16x1xf32> -> vector<4x16x1xf32>
    %263 = vector.broadcast %262 : vector<4x16x1xf32> to vector<4x16x16xf32>
    %264 = arith.mulf %259, %263 : vector<4x16x16xf32>
    %265 = arith.truncf %264 : vector<4x16x16xf32> to vector<4x16x16xbf16>
    %266 = arith.truncf %248 : vector<4x16x8xf32> to vector<4x16x8xbf16>
    %cst_61 = arith.constant dense<0.000000e+00> : vector<4x16x8xf32>
    %267 = tpu.matmul %265, %266, %cst_61 {dimension_numbers = #tpu.dot_dimension_numbers<[2], [1], [1], [2], [0, 0, 0, 1, 1, 2], [0], [0]>} : vector<4x16x16xbf16>, vector<4x16x8xbf16>, vector<4x16x8xf32> -> vector<4x16x8xf32>
    %268 = vector.extract_strided_slice %267 {offsets = [0, 0, 0], sizes = [1, 16, 8], strides = [1, 1, 1]} : vector<4x16x8xf32> to vector<1x16x8xf32>
    %269 = vector.shape_cast %268 : vector<1x16x8xf32> to vector<16x8xf32>
    %270 = vector.extract_strided_slice %267 {offsets = [1, 0, 0], sizes = [1, 16, 8], strides = [1, 1, 1]} : vector<4x16x8xf32> to vector<1x16x8xf32>
    %271 = vector.shape_cast %270 : vector<1x16x8xf32> to vector<16x8xf32>
    %272 = vector.extract_strided_slice %267 {offsets = [2, 0, 0], sizes = [1, 16, 8], strides = [1, 1, 1]} : vector<4x16x8xf32> to vector<1x16x8xf32>
    %273 = vector.shape_cast %272 : vector<1x16x8xf32> to vector<16x8xf32>
    %274 = vector.extract_strided_slice %267 {offsets = [3, 0, 0], sizes = [1, 16, 8], strides = [1, 1, 1]} : vector<4x16x8xf32> to vector<1x16x8xf32>
    %275 = vector.shape_cast %274 : vector<1x16x8xf32> to vector<16x8xf32>
    %276 = tpu.concatenate %269, %271, %273, %275 in 1 : vector<16x8xf32>, vector<16x8xf32>, vector<16x8xf32>, vector<16x8xf32> -> vector<16x32xf32>
    %277 = arith.truncf %276 : vector<16x32xf32> to vector<16x32xbf16>
    %cst_62 = arith.constant dense<0.000000e+00> : vector<16x32xf32>
    %278 = tpu.matmul %277, %219, %cst_62 {dimension_numbers = #tpu.dot_dimension_numbers<[1], [0], [0], [1], [0, 0, 1, 1], [], []>} : vector<16x32xbf16>, vector<32x32xbf16>, vector<16x32xf32> -> vector<16x32xf32>
    %279 = arith.addf %197, %278 : vector<16x32xf32>
    %280 = arith.mulf %279, %279 : vector<16x32xf32>
    %cst_63 = arith.constant dense<0.000000e+00> : vector<16xf32>
    %281 = vector.multi_reduction <add>, %280, %cst_63 [1] : vector<16x32xf32> to vector<16xf32>
    %282 = vector.shape_cast %281 : vector<16xf32> to vector<16x1xf32>
    %cst_64 = arith.constant 3.200000e+01 : f32
    %283 = vector.broadcast %cst_64 : f32 to vector<16x1xf32>
    %284 = arith.divf %282, %283 : vector<16x1xf32>
    %cst_65 = arith.constant 9.99999997E-7 : f32
    %285 = vector.broadcast %cst_65 : f32 to vector<16x1xf32>
    %286 = arith.addf %284, %285 : vector<16x1xf32>
    %287 = math.rsqrt %286 : vector<16x1xf32>
    %288 = vector.broadcast %287 : vector<16x1xf32> to vector<16x32xf32>
    %289 = arith.mulf %279, %288 : vector<16x32xf32>
    %290 = vector.extract_strided_slice %0 {offsets = [5, 0], sizes = [1, 32], strides = [1, 1]} : vector<8x32xf32> to vector<1x32xf32>
    %291 = vector.broadcast %290 : vector<1x32xf32> to vector<16x32xf32>
    %292 = arith.mulf %289, %291 : vector<16x32xf32>
    %c0_66 = arith.constant 0 : index
    %c384 = arith.constant 384 : index
    %293 = vector.load %arg6[%c0_66, %c384] : memref<32x544xbf16, #tpu.memory_space<vmem>>, vector<32x64xbf16>
    %294 = arith.truncf %292 : vector<16x32xf32> to vector<16x32xbf16>
    %cst_67 = arith.constant dense<0.000000e+00> : vector<16x64xf32>
    %295 = tpu.matmul %294, %293, %cst_67 {dimension_numbers = #tpu.dot_dimension_numbers<[1], [0], [0], [1], [0, 0, 1, 1], [], []>} : vector<16x32xbf16>, vector<32x64xbf16>, vector<16x64xf32> -> vector<16x64xf32>
    %cst_68 = arith.constant 0.000000e+00 : f32
    %296 = vector.broadcast %cst_68 : f32 to vector<16x64xf32>
    %297 = arith.maximumf %295, %296 : vector<16x64xf32>
    %c0_69 = arith.constant 0 : index
    %c32_70 = arith.constant 32 : index
    %298 = vector.load %arg7[%c0_69, %c32_70] : memref<64x64xbf16, #tpu.memory_space<vmem>>, vector<64x32xbf16>
    %299 = arith.truncf %297 : vector<16x64xf32> to vector<16x64xbf16>
    %cst_71 = arith.constant dense<0.000000e+00> : vector<16x32xf32>
    %300 = tpu.matmul %299, %298, %cst_71 {dimension_numbers = #tpu.dot_dimension_numbers<[1], [0], [0], [1], [0, 0, 1, 1], [], []>} : vector<16x64xbf16>, vector<64x32xbf16>, vector<16x32xf32> -> vector<16x32xf32>
    %301 = arith.addf %279, %300 : vector<16x32xf32>
    %302 = arith.mulf %301, %301 : vector<16x32xf32>
    %cst_72 = arith.constant dense<0.000000e+00> : vector<16xf32>
    %303 = vector.multi_reduction <add>, %302, %cst_72 [1] : vector<16x32xf32> to vector<16xf32>
    %304 = vector.shape_cast %303 : vector<16xf32> to vector<16x1xf32>
    %cst_73 = arith.constant 3.200000e+01 : f32
    %305 = vector.broadcast %cst_73 : f32 to vector<16x1xf32>
    %306 = arith.divf %304, %305 : vector<16x1xf32>
    %cst_74 = arith.constant 9.99999997E-7 : f32
    %307 = vector.broadcast %cst_74 : f32 to vector<16x1xf32>
    %308 = arith.addf %306, %307 : vector<16x1xf32>
    %309 = math.rsqrt %308 : vector<16x1xf32>
    %310 = vector.broadcast %309 : vector<16x1xf32> to vector<16x32xf32>
    %311 = arith.mulf %301, %310 : vector<16x32xf32>
    %312 = vector.extract_strided_slice %0 {offsets = [6, 0], sizes = [1, 32], strides = [1, 1]} : vector<8x32xf32> to vector<1x32xf32>
    %313 = vector.broadcast %312 : vector<1x32xf32> to vector<16x32xf32>
    %314 = arith.mulf %311, %313 : vector<16x32xf32>
    %c0_75 = arith.constant 0 : index
    %c0_76 = arith.constant 0 : index
    %c0_77 = arith.constant 0 : index
    %315 = vector.load %arg5[%c0_75, %c0_76, %c0_77] : memref<1x2x16xf32, #tpu.memory_space<vmem>>, vector<1x2x16xf32>
    %316 = vector.shape_cast %315 : vector<1x2x16xf32> to vector<2x16xf32>
    %cst_78 = arith.constant dense<0.000000e+00> : vector<2x32xf32>
    %317 = tpu.matmul %316, %314, %cst_78 {dimension_numbers = #tpu.dot_dimension_numbers<[1], [0], [0], [1], [0, 0, 1, 1], [], []>} : vector<2x16xf32>, vector<16x32xf32>, vector<2x32xf32> -> vector<2x32xf32>
    %318 = arith.mulf %317, %317 : vector<2x32xf32>
    %cst_79 = arith.constant dense<0.000000e+00> : vector<2xf32>
    %319 = vector.multi_reduction <add>, %318, %cst_79 [1] : vector<2x32xf32> to vector<2xf32>
    %320 = vector.shape_cast %319 : vector<2xf32> to vector<2x1xf32>
    %cst_80 = arith.constant 1.000000e-24 : f32
    %321 = vector.broadcast %cst_80 : f32 to vector<2x1xf32>
    %322 = arith.maximumf %320, %321 : vector<2x1xf32>
    %323 = math.rsqrt %322 : vector<2x1xf32>
    %324 = vector.broadcast %323 : vector<2x1xf32> to vector<2x32xf32>
    %325 = arith.mulf %317, %324 : vector<2x32xf32>
    %c0_81 = arith.constant 0 : index
    %c0_82 = arith.constant 0 : index
    %326 = vector.load %arg9[%c0_81, %c0_82] : memref<2x32xf32, #tpu.memory_space<vmem>>, vector<2x32xf32>
    tpu.vector_store %arg9[%c0_81, %c0_82], %325 {strides = array<i32>} : memref<2x32xf32, #tpu.memory_space<vmem>>, vector<2x32xf32>,
    return
  }
  func.func @transform_0(%arg0: i32) -> (i32, i32) {
    %c0_i32 = arith.constant 0 : i32
    %c0_i32_0 = arith.constant 0 : i32
    return %arg0, %c0_i32 : i32, i32
  }
  func.func @transform_1(%arg0: i32) -> (i32, i32, i32, i32) {
    %c0_i32 = arith.constant 0 : i32
    %c0_i32_0 = arith.constant 0 : i32
    %c0_i32_1 = arith.constant 0 : i32
    %c0_i32_2 = arith.constant 0 : i32
    return %arg0, %c0_i32, %c0_i32_0, %c0_i32_1 : i32, i32, i32, i32
  }
  func.func @transform_2(%arg0: i32) -> (i32, i32, i32, i32) {
    %c0_i32 = arith.constant 0 : i32
    %c0_i32_0 = arith.constant 0 : i32
    %c0_i32_1 = arith.constant 0 : i32
    %c0_i32_2 = arith.constant 0 : i32
    return %arg0, %c0_i32, %c0_i32_0, %c0_i32_1 : i32, i32, i32, i32
  }
  func.func @transform_3(%arg0: i32) -> (i32, i32, i32) {
    %c0_i32 = arith.constant 0 : i32
    %c0_i32_0 = arith.constant 0 : i32
    %c0_i32_1 = arith.constant 0 : i32
    return %arg0, %c0_i32, %c0_i32_0 : i32, i32, i32
  }
  func.func @transform_4(%arg0: i32) -> (i32, i32, i32) {
    %c0_i32 = arith.constant 0 : i32
    %c0_i32_0 = arith.constant 0 : i32
    %c0_i32_1 = arith.constant 0 : i32
    return %arg0, %c0_i32, %c0_i32_0 : i32, i32, i32
  }
  func.func @transform_5(%arg0: i32) -> (i32, i32) {
    %c0_i32 = arith.constant 0 : i32
    %c0_i32_0 = arith.constant 0 : i32
    %c0_i32_1 = arith.constant 0 : i32
    return %c0_i32, %c0_i32_0 : i32, i32
  }
  func.func @transform_6(%arg0: i32) -> (i32, i32) {
    %c0_i32 = arith.constant 0 : i32
    %c0_i32_0 = arith.constant 0 : i32
    %c0_i32_1 = arith.constant 0 : i32
    return %c0_i32, %c0_i32_0 : i32, i32
  }
  func.func @transform_7(%arg0: i32) -> (i32, i32) {
    %c0_i32 = arith.constant 0 : i32
    %c0_i32_0 = arith.constant 0 : i32
    %c0_i32_1 = arith.constant 0 : i32
    return %c0_i32, %c0_i32_0 : i32, i32
  }
  func.func @transform_8(%arg0: i32) -> (i32, i32) {
    %c0_i32 = arith.constant 0 : i32
    %c0_i32_0 = arith.constant 0 : i32
    return %arg0, %c0_i32 : i32, i32
  }
}

</mosaic_0001>

<bundles_post_ra>
// kernel: model_forward_impl.1
= control target key start
LH: loop header
LB: loop body
LE: loop exit
PB: predicated region body
PF: predicated region fallthrough
CT: control target
= control target key end

     0   :  { %vm54_vm0 = vcmask 261120   ;;  %s4052_s0 = inlined_call_operand.vmem [shape: f32[32,32], index: 0, kind: input, shape index: {}]   ;;  %s4053_s1 = inlined_call_operand.vmem [shape: f32[1,4,16,16], index: 1, kind: input, shape index: {}]   ;;  %s4054_s2 = inlined_call_operand.vmem [shape: f32[1,4,16,16], index: 2, kind: input, shape index: {}]   ;;  %s4055_s3 = inlined_call_operand.vmem [shape: f32[1,16,16], index: 3, kind: input, shape index: {}]   ;;  %s4056_s4 = inlined_call_operand.vmem [shape: f32[1,2,16], index: 4, kind: input, shape index: {}]   ;;  %s4057_s5 = inlined_call_operand.vmem [shape: bf16[32,544], index: 5, kind: input, shape index: {}]   ;;  %s4058_s6 = inlined_call_operand.vmem [shape: bf16[64,64], index: 6, kind: input, shape index: {}]   ;;  %s4059_s7 = inlined_call_operand.vmem [shape: f32[8,32], index: 7, kind: input, shape index: {}]   ;;  %s4060_s8 = inlined_call_operand.hbm [shape: f32[2,32], index: 8, kind: output, shape index: {}]  }
   0x1   :  { %v3204_v0 = vld [vmem:[%s4057_s5] ss:$20 sps:$4 sm:$0xff]   ;;  %v3205_v1 = vld [vmem:[%s4057_s5 + $0x28] ss:$20 sps:$4 sm:$0xff]  }
   0x2   :  { %2828 = vmatprep.subr.bf16.mxu1 %v3204_v0  ;;  %v32_v2 = vld [vmem:[%s4052_s0] sm:$0xff]  ;;  %v33_v3 = vld [vmem:[%s4052_s0 + $0x8] sm:$0xff]  ;;  %v34_v4 = vld [vmem:[%s4052_s0 + $0x10] sm:$0xff] }
   0x3   :  { %2829 = vmatpush3.bf16.msra.mxu1 %v3204_v0  ;;  %v40_v5 = vpack.c.bf16 %v33_v3, %v32_v2  ;;  %v35_v6 = vld [vmem:[%s4052_s0 + $0x18] sm:$0xff] }
   0x4   :  { %2830 = vmatprep.subr.bf16.mxu1 %v3205_v1  ;;  %v41_v7 = vpack.c.bf16 %v35_v6, %v34_v4 }
   0x5   :  { %2832 = vmatprep.mubr.msk.bf16.mxu1 %vm54_vm0, %v40_v5 }
   0x7   :  { %2831 = vmatpush3.bf16.msra.mxu1 %v3205_v1 }
   0xa   :  { %2833 = vmatmul.mubr.msk.bf16.vlgmr.msra.gmra.mrb[0].mxu1 %vm54_vm0, %v41_v7 }
   0xb   :  { %13 = vsyncpa [#allocation3], 0  ;;  %s3381_s17 = smov 96   ;;  %v3382_v17 = vmov 0.0   ;;  %vm3383_vm1 = vmmov 0   ;;  %v127_v24 = vlaneseq  ;;  %v3489_v29 = vld [vmem:[%s4059_s7] sm:$0xff] }
   0xc   :  { %134 = vrot.lane.b32.xlu1 %v3204_v0, %s3381_s17  ;;  %2836 = vmatprep.subr.bf16.mxu1 %v3382_v17  ;;  %s3384_s19 = smov 112   ;;  %s3385_s20 = smov 120   ;;  %vm223_vm2 = vcmask 64512   ;;  %v188_v63 = vld [vmem:[%s4053_s1] sm:$0xff]  ;;  %vm421_vm3 = vcmask 130048   ;;  %vm730_vm4 = vcmask 195584  }
   0xd   :  { %2844 = vmatprep.subr.bf16.mxu0 %v3382_v17  ;;  %2840 = vmatprep.mubr.msk.bf16.mxu1 %vm3383_vm1, %v3382_v17  ;;  %v3483_v26 = vshrl.u32 %v127_v24, 7  ;;  %s3386_s21 = smov 104   ;;  %s3387_s16 = smov 64   ;;  %vm914_vm5 = vcmask 523264   ;;  %vm2658_vm6 = vcmask 254976  }
   0xe   :  { %2846 = vmatprep.mubr.msk.bf16.mxu0 %vm3383_vm1, %v3382_v17  ;;  %s3388_s18 = smov 8   ;;  %s3389_s22 = smov 16  }
   0xf   :  { %v129_v27 = vsub.s32 0, %v3483_v26  ;;  %s3390_s25 = smov 24  }
  0x10   :  { %136 = vrot.lane.b32.xlu1 %v3205_v1, %s3381_s17  ;;  %v189_v1 = vld [vmem:[%s4053_s1 + $0x8] sm:$0xff] }
  0x11   :  { %v130_v31 = vrot.slane %v3489_v29, %v129_v27 }
  0x7e   :  { %v135_v16 = vpop.permute.xlu1 %134 }
  0x7f   :  { %2837 = vmatpush3.bf16.msra.mxu1 %v135_v16 }
  0x80   :  { %2838 = vmatprep.subr.bf16.mxu1 %v3382_v17 }
  0x82   :  { %v137_v18 = vpop.permute.xlu1 %136 }
  0x83   :  { %2839 = vmatpush3.bf16.msra.mxu1 %v137_v18 }
  0x84   :  { %2850 = vmatprep.subr.bf16.mxu1 %v3382_v17 }
  0xdd   :  { %v3461_v8 = vpop.f32.mrb[0].mxu1 }
  0xde   :  { %v3463_v9 = vpop.f32.mrb[1].mxu1 }
  0xdf   :  { %v3465_v10 = vpop.f32.mrb[2].mxu1  ;;  %v110_v11 = vmul.f32 %v3463_v9, %v3463_v9 }
  0xe0   :  { %v3469_v12 = vpop.f32.mrb[3].mxu1 }
  0xe1   :  { %v112_v13 = vsel %vm54_vm0, %v110_v11, 0.0  ;;  %v111_v14 = vmul.f32 %v3469_v12, %v3469_v12 }
  0xe2   :  { %113 = vadd.xlane.f32.xlu0 %v112_v13  ;;  %v190_v13 = vld [vmem:[%s4053_s1 + $0x10] sm:$0xff] }
  0xe3   :  { %v115_v15 = vsel %vm54_vm0, %v111_v14, 0.0 }
  0xe6   :  { %116 = vadd.xlane.f32.xlu0 %v115_v15  ;;  %v191_v15 = vld [vmem:[%s4053_s1 + $0x18] sm:$0xff] }
 0x16f   :  { %v114_v19 = vpop.xlane.xlu0 %113 }
 0x170   :  { %v119_v20 = vmul.f32 0.03125, %v114_v19 }
 0x172   :  { %v121_v21 = vadd.f32 1e-06, %v119_v20  ;;  %v192_v20 = vld [vmem:[%s4053_s1 + $0x20] sm:$0xff] }
 0x173   :  { %v117_v22 = vpop.xlane.xlu0 %116 }
 0x174   :  { %3224 = vrsqrt.f32 %v121_v21  ;;  %v120_v23 = vmul.f32 0.03125, %v117_v22 }
 0x176   :  { %v122_v25 = vadd.f32 1e-06, %v120_v23 }
 0x178   :  { %3226 = vrsqrt.f32 %v122_v25  ;;  %v193_v25 = vld [vmem:[%s4053_s1 + $0x28] sm:$0xff] }
 0x17e   :  { %v3225_v28 = vpop.eup %3224 }
 0x17f   :  { %v125_v30 = vmul.f32 %v3225_v28, %v3463_v9 }
 0x181   :  { %v131_v34 = vmul.f32 %v130_v31, %v125_v30 }
 0x182   :  { %v3227_v32 = vpop.eup %3226 }
 0x183   :  { %v126_v33 = vmul.f32 %v3227_v32, %v3469_v12 }
 0x185   :  { %v132_v35 = vmul.f32 %v130_v31, %v126_v33  ;;  %v194_v31 = vld [vmem:[%s4053_s1 + $0x30] sm:$0xff] }
 0x187   :  { %v133_v36 = vpack.c.bf16 %v132_v35, %v131_v34 }
 0x189   :  { %2841 = vmatmul.mubr.msk.bf16.vlgmr.msra.gmra.mrb[4].mxu1 %vm54_vm0, %v133_v36 }
 0x18a   :  { %2852 = vmatprep.mubr.msk.bf16.mxu1 %vm3383_vm1, %v3382_v17 }
 0x25c   :  { %v177_v37 = vpop.f32.mrb[4].mxu1 }
 0x25d   :  { %v2842_v38 = vpop.f32.mrb[5].mxu1 }
 0x25e   :  { %v180_v39 = vpop.f32.mrb[6].mxu1 }
 0x25f   :  { %v2843_v40 = vpop.f32.mrb[7].mxu1  ;;  %v3104_v41 = vpack.i.bf16 %v180_v39, %v177_v37  ;;  %v3497_v42 = vpack.c.bf16 %v180_v39, %v177_v37  ;;  %v195_v37 = vld [vmem:[%s4053_s1 + $0x38] sm:$0xff] }
 0x261   :  { %3105 = vrot.lane.b32.xlu1 %v3104_v41, %s3384_s19  ;;  %3100 = vrot.lane.b32.xlu0 %v3104_v41, %s3385_s20 }
 0x265   :  { %3110 = vrot.lane.b32.xlu1 %v3104_v41, %s3386_s21 }
 0x269   :  { %221 = vrot.lane.b32.xlu1 %v3497_v42, %s3381_s17 }
 0x2d3   :  { %v3106_v43 = vpop.permute.xlu1 %3105  ;;  %v3101_v44 = vpop.permute.xlu0 %3100 }
 0x2d4   :  { %v3103_v45 = vunpack.i.h.bf16 %v3101_v44  ;;  %v3102_v46 = vunpack.i.l.bf16 %v3101_v44  ;;  %v3108_v47 = vunpack.i.h.bf16 %v3106_v43  ;;  %v3107_v48 = vunpack.i.l.bf16 %v3106_v43 }
 0x2d6   :  { %v3504_v49 = vpack.c.bf16 %v3103_v45, %v3102_v46  ;;  %v3508_v53 = vpack.c.bf16 %v3108_v47, %v3107_v48 }
 0x2d7   :  { %v3111_v50 = vpop.permute.xlu1 %3110 }
 0x2d8   :  { %272 = vrot.lane.b32.xlu1 %v3504_v49, %s3381_s17  ;;  %v3113_v51 = vunpack.i.h.bf16 %v3111_v50  ;;  %v3112_v52 = vunpack.i.l.bf16 %v3111_v50 }
 0x2da   :  { %v3513_v56 = vpack.c.bf16 %v3113_v51, %v3112_v52 }
 0x2db   :  { %v222_v54 = vpop.permute.xlu1 %221 }
 0x2dc   :  { %322 = vrot.lane.b32.xlu1 %v3508_v53, %s3381_s17  ;;  %v228_v55 = vsel %vm223_vm2, %v222_v54, 0 }
 0x2dd   :  { %2845 = vmatpush3.bf16.xpose.msra.mxu0 %v228_v55 }
 0x2de   :  { %2856 = vmatprep.subr.bf16.mxu0 %v3382_v17 }
 0x2e0   :  { %372 = vrot.lane.b32.xlu1 %v3513_v56, %s3381_s17 }
 0x2e4   :  { %2847 = vmatmul.mubr.msk.bf16.vlgmr.msra.gmra.mrb[0].mxu0 %vm223_vm2, %v3497_v42 }
 0x2e5   :  { %2858 = vmatprep.mubr.msk.bf16.mxu0 %vm3383_vm1, %v3382_v17 }
 0x34a   :  { %v273_v57 = vpop.permute.xlu1 %272 }
 0x34b   :  { %v278_v58 = vsel %vm223_vm2, %v273_v57, 0 }
 0x34c   :  { %2851 = vmatpush3.bf16.xpose.msra.mxu1 %v278_v58 }
 0x34d   :  { %2862 = vmatprep.subr.bf16.mxu1 %v3382_v17 }
 0x34e   :  { %v323_v59 = vpop.permute.xlu1 %322 }
 0x34f   :  { %v328_v60 = vsel %vm223_vm2, %v323_v59, 0 }
 0x350   :  { %2857 = vmatpush3.bf16.xpose.msra.mxu0 %v328_v60 }
 0x351   :  { %2868 = vmatprep.subr.bf16.mxu0 %v3382_v17 }
 0x352   :  { %v373_v61 = vpop.permute.xlu1 %372 }
 0x353   :  { %v378_v62 = vsel %vm223_vm2, %v373_v61, 0  ;;  %2853 = vmatmul.mubr.msk.bf16.vlgmr.msra.gmra.mrb[8].mxu1 %vm223_vm2, %v3504_v49 }
 0x354   :  { %2863 = vmatpush3.bf16.xpose.msra.mxu1 %v378_v62  ;;  %2864 = vmatprep.mubr.msk.bf16.mxu1 %vm3383_vm1, %v3382_v17 }
 0x355   :  { %2874 = vmatprep.subr.bf16.mxu1 %v3382_v17 }
 0x357   :  { %2859 = vmatmul.mubr.msk.bf16.vlgmr.msra.gmra.mrb[4].mxu0 %vm223_vm2, %v3508_v53 }
 0x358   :  { %2870 = vmatprep.mubr.msk.bf16.mxu0 %vm3383_vm1, %v3382_v17 }
 0x35b   :  { %2865 = vmatmul.mubr.msk.bf16.vlgmr.msra.gmra.mrb[12].mxu1 %vm223_vm2, %v3513_v56 }
 0x35c   :  { %2876 = vmatprep.mubr.msk.bf16.mxu1 %vm3383_vm1, %v3382_v17 }
 0x3b7   :  { %v264_v0 = vpop.f32.mrb[0].mxu0 }
 0x3b8   :  { %v265_v2 = vadd.f32 %v264_v0, %v188_v63  ;;  %v2848_v3 = vpop.f32.mrb[1].mxu0 }
 0x3b9   :  { %v267_v4 = vpop.f32.mrb[2].mxu0 }
 0x3ba   :  { %v268_v5 = vadd.f32 %v267_v4, %v189_v1  ;;  %v2849_v6 = vpop.f32.mrb[3].mxu0  ;;  %v422_v7 = vsel %vm421_vm3, %v265_v2, -inf }
 0x3bb   :  { %423 = vmax.xlane.f32.xlu0 %v422_v7 }
 0x3bc   :  { %v425_v11 = vsel %vm421_vm3, %v268_v5, -inf }
 0x3bd   :  { %426 = vmax.xlane.f32.xlu1 %v425_v11 }
 0x426   :  { %v314_v14 = vpop.f32.mrb[8].mxu1 }
 0x427   :  { %v315_v16 = vadd.f32 %v314_v14, %v190_v13  ;;  %v2854_v18 = vpop.f32.mrb[9].mxu1 }
 0x428   :  { %v317_v19 = vpop.f32.mrb[10].mxu1 }
 0x429   :  { %v318_v21 = vadd.f32 %v317_v19, %v191_v15  ;;  %v2855_v22 = vpop.f32.mrb[11].mxu1  ;;  %v428_v23 = vsel %vm421_vm3, %v315_v16, -inf }
 0x42a   :  { %v364_v24 = vpop.f32.mrb[4].mxu0  ;;  %429 = vmax.xlane.f32.xlu0 %v428_v23 }
 0x42b   :  { %v365_v27 = vadd.f32 %v364_v24, %v192_v20  ;;  %v2860_v28 = vpop.f32.mrb[5].mxu0  ;;  %v431_v35 = vsel %vm421_vm3, %v318_v21, -inf }
 0x42c   :  { %v367_v30 = vpop.f32.mrb[6].mxu0 }
 0x42d   :  { %v368_v32 = vadd.f32 %v367_v30, %v193_v25  ;;  %v2861_v33 = vpop.f32.mrb[7].mxu0  ;;  %v434_v34 = vsel %vm421_vm3, %v365_v27, -inf }
 0x42e   :  { %435 = vmax.xlane.f32.xlu1 %v434_v34  ;;  %432 = vmax.xlane.f32.xlu0 %v431_v35  ;;  %v414_v36 = vpop.f32.mrb[12].mxu1 }
 0x42f   :  { %v415_v38 = vadd.f32 %v414_v36, %v194_v31  ;;  %v2866_v39 = vpop.f32.mrb[13].mxu1  ;;  %v437_v44 = vsel %vm421_vm3, %v368_v32, -inf }
 0x430   :  { %v417_v40 = vpop.f32.mrb[14].mxu1 }
 0x431   :  { %v418_v41 = vadd.f32 %v417_v40, %v195_v37  ;;  %v2867_v43 = vpop.f32.mrb[15].mxu1  ;;  %v440_v45 = vsel %vm421_vm3, %v415_v38, -inf }
 0x432   :  { %438 = vmax.xlane.f32.xlu0 %v437_v44  ;;  %441 = vmax.xlane.f32.xlu1 %v440_v45 }
 0x433   :  { %v443_v46 = vsel %vm421_vm3, %v418_v41, -inf }
 0x436   :  { %444 = vmax.xlane.f32.xlu0 %v443_v46 }
 0x443   :  { %514 = vrot.lane.b32.xlu1 %v3497_v42, %s3387_s16 }
 0x448   :  { %v424_v51 = vpop.xlane.xlu0 %423 }
 0x449   :  { %v446_v52 = vsub.f32 %v265_v2, %v424_v51 }
 0x44a   :  { %v427_v47 = vpop.xlane.xlu1 %426 }
 0x44b   :  { %v447_v48 = vsub.f32 %v268_v5, %v427_v47  ;;  %v454_v54 = vmul.f32 1.442695, %v446_v52 }
 0x44d   :  { %v456_v50 = vmul.f32 1.442695, %v447_v48 }
 0x44f   :  { %3228 = vpow2.f32 %v456_v50 }
 0x450   :  { %3230 = vpow2.f32 %v454_v54 }
 0x459   :  { %v3229_v55 = vpop.eup %3228 }
 0x45a   :  { %v473_v57 = vsel %vm421_vm3, %v3229_v55, 0.0  ;;  %v3231_v58 = vpop.eup %3230 }
 0x45b   :  { %474 = vadd.xlane.f32.xlu0 %v473_v57  ;;  %v470_v59 = vsel %vm421_vm3, %v3231_v58, 0.0 }
 0x467   :  { %471 = vadd.xlane.f32.xlu1 %v470_v59 }
 0x4b7   :  { %v430_v60 = vpop.xlane.xlu0 %429 }
 0x4b8   :  { %v448_v61 = vsub.f32 %v315_v16, %v430_v60 }
 0x4ba   :  { %v458_v62 = vmul.f32 1.442695, %v448_v61 }
 0x4bb   :  { %v436_v42 = vpop.xlane.xlu1 %435  ;;  %v433_v63 = vpop.xlane.xlu0 %432 }
 0x4bc   :  { %3232 = vpow2.f32 %v458_v62  ;;  %v450_v0 = vsub.f32 %v365_v27, %v436_v42  ;;  %v449_v1 = vsub.f32 %v318_v21, %v433_v63 }
 0x4be   :  { %v462_v3 = vmul.f32 1.442695, %v450_v0  ;;  %v460_v2 = vmul.f32 1.442695, %v449_v1  ;;  %v3607_v0 = vld [vmem:[%s4057_s5 + $0xc] ss:$20 sps:$4 sm:$0xff]  }
 0x4bf   :  { %v439_v4 = vpop.xlane.xlu0 %438  ;;  %v442_v5 = vpop.xlane.xlu1 %441 }
 0x4c0   :  { %3234 = vpow2.f32 %v462_v3  ;;  %v451_v6 = vsub.f32 %v368_v32, %v439_v4  ;;  %v452_v7 = vsub.f32 %v415_v38, %v442_v5 }
 0x4c1   :  { %3236 = vpow2.f32 %v460_v2 }
 0x4c2   :  { %v464_v11 = vmul.f32 1.442695, %v451_v6  ;;  %v466_v13 = vmul.f32 1.442695, %v452_v7 }
 0x4c3   :  { %v515_v14 = vpop.permute.xlu1 %514  ;;  %v445_v15 = vpop.xlane.xlu0 %444 }
 0x4c4   :  { %3238 = vpow2.f32 %v464_v11  ;;  %v453_v16 = vsub.f32 %v418_v41, %v445_v15  ;;  %2869 = vmatpush3.bf16.msra.mxu0 %v515_v14 }
 0x4c5   :  { %3240 = vpow2.f32 %v466_v13  ;;  %2880 = vmatprep.subr.bf16.mxu0 %v3382_v17 }
 0x4c6   :  { %v3233_v18 = vpop.eup %3232  ;;  %v468_v19 = vmul.f32 1.442695, %v453_v16 }
 0x4c7   :  { %v476_v20 = vsel %vm421_vm3, %v3233_v18, 0.0 }
 0x4c8   :  { %3242 = vpow2.f32 %v468_v19  ;;  %477 = vadd.xlane.f32.xlu1 %v476_v20 }
 0x4ca   :  { %v3235_v21 = vpop.eup %3234 }
 0x4cb   :  { %v3237_v22 = vpop.eup %3236  ;;  %v482_v23 = vsel %vm421_vm3, %v3235_v21, 0.0 }
 0x4cc   :  { %483 = vadd.xlane.f32.xlu1 %v482_v23  ;;  %v479_v24 = vsel %vm421_vm3, %v3237_v22, 0.0 }
 0x4cd   :  { %480 = vadd.xlane.f32.xlu0 %v479_v24  ;;  %v3617_v24 = vld [vmem:[%s4057_s5 + $0x34] ss:$20 sps:$4 sm:$0xff]  }
 0x4ce   :  { %v3239_v25 = vpop.eup %3238 }
 0x4cf   :  { %v3241_v27 = vpop.eup %3240  ;;  %v485_v28 = vsel %vm421_vm3, %v3239_v25, 0.0 }
 0x4d0   :  { %v488_v30 = vsel %vm421_vm3, %v3241_v27, 0.0 }
 0x4d1   :  { %489 = vadd.xlane.f32.xlu1 %v488_v30  ;;  %486 = vadd.xlane.f32.xlu0 %v485_v28 }
 0x4d2   :  { %v3243_v31 = vpop.eup %3242 }
 0x4d3   :  { %v491_v32 = vsel %vm421_vm3, %v3243_v31, 0.0 }
 0x4d5   :  { %492 = vadd.xlane.f32.xlu0 %v491_v32 }
 0x4e2   :  { %608 = vrot.lane.b32.xlu1 %v3508_v53, %s3387_s16 }
 0x4e6   :  { %655 = vrot.lane.b32.xlu1 %v3513_v56, %s3387_s16 }
 0x4e8   :  { %v475_v33 = vpop.xlane.xlu0 %474 }
 0x4e9   :  { %3244 = vrcp.f32 %v475_v33 }
 0x4eb   :  { %561 = vrot.lane.b32.xlu0 %v3504_v49, %s3387_s16 }
 0x4ef   :  { %744 = vrot.lane.b32.xlu0 %v3607_v0, %s3387_s16 }
 0x4f3   :  { %v3245_v35 = vpop.eup %3244 }
 0x4f4   :  { %v472_v34 = vpop.xlane.xlu1 %471  ;;  %v503_v37 = vmul.f32 %v3245_v35, %v3229_v55 }
 0x4f5   :  { %3246 = vrcp.f32 %v472_v34 }
 0x4ff   :  { %v3247_v36 = vpop.eup %3246 }
 0x500   :  { %v502_v38 = vmul.f32 %v3247_v36, %v3231_v58 }
 0x502   :  { %v510_v39 = vpack.c.bf16 %v503_v37, %v502_v38 }
 0x504   :  { %2871 = vmatmul.mubr.msk.bf16.vlgmr.msra.gmra.mrb[8].mxu0 %vm421_vm3, %v510_v39 }
 0x505   :  { %2882 = vmatprep.mubr.msk.bf16.mxu0 %vm3383_vm1, %v3382_v17 }
 0x555   :  { %v478_v53 = vpop.xlane.xlu1 %477 }
 0x556   :  { %3248 = vrcp.f32 %v478_v53 }
 0x559   :  { %v484_v56 = vpop.xlane.xlu1 %483 }
 0x55a   :  { %v481_v40 = vpop.xlane.xlu0 %480 }
 0x55b   :  { %3250 = vrcp.f32 %v481_v40 }
 0x55c   :  { %3252 = vrcp.f32 %v484_v56 }
 0x55e   :  { %v490_v49 = vpop.xlane.xlu1 %489  ;;  %v487_v41 = vpop.xlane.xlu0 %486 }
 0x55f   :  { %3254 = vrcp.f32 %v487_v41 }
 0x560   :  { %3256 = vrcp.f32 %v490_v49  ;;  %v3249_v45 = vpop.eup %3248 }
 0x561   :  { %v504_v47 = vmul.f32 %v3249_v45, %v3233_v18 }
 0x562   :  { %v609_v43 = vpop.permute.xlu1 %608  ;;  %v493_v44 = vpop.xlane.xlu0 %492 }
 0x563   :  { %3258 = vrcp.f32 %v493_v44  ;;  %2881 = vmatpush3.bf16.msra.mxu0 %v609_v43 }
 0x564   :  { %2892 = vmatprep.subr.bf16.mxu0 %v3382_v17 }
 0x565   :  { %v3251_v46 = vpop.eup %3250 }
 0x566   :  { %v505_v48 = vmul.f32 %v3251_v46, %v3237_v22  ;;  %v562_v50 = vpop.permute.xlu0 %561  ;;  %v3253_v51 = vpop.eup %3252 }
 0x567   :  { %2875 = vmatpush3.bf16.msra.mxu1 %v562_v50  ;;  %v656_v55 = vpop.permute.xlu1 %655  ;;  %v506_v58 = vmul.f32 %v3253_v51, %v3235_v21 }
 0x568   :  { %v511_v52 = vpack.c.bf16 %v505_v48, %v504_v47  ;;  %2886 = vmatprep.subr.bf16.mxu1 %v3382_v17 }
 0x569   :  { %v3255_v54 = vpop.eup %3254 }
 0x56a   :  { %2877 = vmatmul.mubr.msk.bf16.vlgmr.msra.gmra.mrb[16].mxu1 %vm421_vm3, %v511_v52  ;;  %v3257_v57 = vpop.eup %3256  ;;  %v507_v59 = vmul.f32 %v3255_v54, %v3239_v25  ;;  %v745_v5 = vpop.permute.xlu0 %744 }
 0x56b   :  { %2887 = vmatpush3.bf16.msra.mxu1 %v656_v55  ;;  %2888 = vmatprep.mubr.msk.bf16.mxu1 %vm3383_vm1, %v3382_v17  ;;  %v508_v62 = vmul.f32 %v3257_v57, %v3241_v27  ;;  %v984_v55 = vmul.f32 %v3465_v10, %v3465_v10  ;;  %v983_v57 = vmul.f32 %v3461_v8, %v3461_v8 }
 0x56c   :  { %2900 = vmatprep.subr.bf16.mxu1 %v3382_v17  ;;  %v512_v61 = vpack.c.bf16 %v507_v59, %v506_v58  ;;  %v3208_v59 = vld [vmem:[%s4057_s5 + $0x8] ss:$20 sps:$4 sm:$0xff]  }
 0x56d   :  { %v3259_v60 = vpop.eup %3258  ;;  %v985_v58 = vsel %vm54_vm0, %v983_v57, 0.0 }
 0x56e   :  { %v509_v42 = vmul.f32 %v3259_v60, %v3243_v31  ;;  %2883 = vmatmul.mubr.msk.bf16.vlgmr.msra.gmra.mrb[12].mxu0 %vm421_vm3, %v512_v61  ;;  %v3211_v60 = vld [vmem:[%s4057_s5 + $0x2c] ss:$20 sps:$4 sm:$0xff]   ;;  %v3210_v61 = vld [vmem:[%s4057_s5 + $0x4] ss:$20 sps:$4 sm:$0xff]  }
 0x56f   :  { %2896 = vmatprep.mubr.msk.bf16.mxu0 %vm3383_vm1, %v3382_v17  ;;  %2893 = vmatpush3.bf16.msra.mxu0 %v745_v5 }
 0x570   :  { %v513_v63 = vpack.c.bf16 %v509_v42, %v508_v62  ;;  %2894 = vmatprep.subr.bf16.mxu0 %v3382_v17  ;;  %v3213_v62 = vld [vmem:[%s4057_s5 + $0x30] ss:$20 sps:$4 sm:$0xff]  }
 0x571   :  { %v3214_v42 = vld [vmem:[%s4057_s5 + $0x4] ss:$20 sps:$4 sm:$0xff]  }
 0x572   :  { %2889 = vmatmul.mubr.msk.bf16.vlgmr.msra.gmra.mrb[20].mxu1 %vm421_vm3, %v513_v63  ;;  %v3215_v63 = vld [vmem:[%s4057_s5 + $0x2c] ss:$20 sps:$4 sm:$0xff]  }
 0x573   :  { %2904 = vmatprep.mubr.msk.bf16.mxu1 %vm3383_vm1, %v3382_v17  ;;  %2901 = vmatpush3.bf16.msra.mxu1 %v3214_v42 }
 0x574   :  { %2902 = vmatprep.subr.bf16.mxu1 %v3382_v17 }
 0x577   :  { %2903 = vmatpush3.bf16.msra.mxu1 %v3215_v63 }
 0x578   :  { %2920 = vmatprep.subr.bf16.mxu1 %v3382_v17 }
 0x5d7   :  { %v554_v1 = vpop.f32.mrb[8].mxu0 }
 0x5d8   :  { %v2872_v3 = vpop.f32.mrb[9].mxu0 }
 0x5d9   :  { %v557_v2 = vpop.f32.mrb[10].mxu0  ;;  %v3217_v3 = vld [vmem:[%s4058_s6 + $0x8] sm:$0xff]  }
 0x5da   :  { %v2873_v4 = vpop.f32.mrb[11].mxu0 }
 0x63d   :  { %v601_v6 = vpop.f32.mrb[16].mxu1 }
 0x63e   :  { %v2878_v7 = vpop.f32.mrb[17].mxu1 }
 0x63f   :  { %v604_v11 = vpop.f32.mrb[18].mxu1 }
 0x640   :  { %v3114_v13 = vpack.i.bf16 %v604_v11, %v601_v6  ;;  %v2879_v14 = vpop.f32.mrb[19].mxu1 }
 0x641   :  { %v648_v15 = vpop.f32.mrb[12].mxu0 }
 0x642   :  { %3115 = vrot.lane.b32.xlu1 %v3114_v13, %s3388_s18  ;;  %v2884_v16 = vpop.f32.mrb[13].mxu0 }
 0x643   :  { %v651_v18 = vpop.f32.mrb[14].mxu0 }
 0x644   :  { %v3119_v19 = vpack.i.bf16 %v651_v18, %v648_v15  ;;  %v2885_v20 = vpop.f32.mrb[15].mxu0 }
 0x645   :  { %v695_v21 = vpop.f32.mrb[20].mxu1  ;;  %v814_v20 = vsub.s32 1, %v3483_v26 }
 0x646   :  { %v2890_v22 = vpop.f32.mrb[21].mxu1  ;;  %3120 = vrot.lane.b32.xlu0 %v3119_v19, %s3389_s22 }
 0x647   :  { %v698_v23 = vpop.f32.mrb[22].mxu1 }
 0x648   :  { %v3124_v25 = vpack.i.bf16 %v698_v23, %v695_v21  ;;  %v2891_v27 = vpop.f32.mrb[23].mxu1  ;;  %v815_v23 = vrot.slane %v3489_v29, %v814_v20 }
 0x64a   :  { %3125 = vrot.lane.b32.xlu1 %v3124_v25, %s3390_s25  ;;  %746 = vrot.lane.b32.xlu0 %v3617_v24, %s3387_s16  ;;  %v1001_v25 = vsub.s32 3, %v3483_v26 }
 0x6b4   :  { %v3116_v28 = vpop.permute.xlu1 %3115 }
 0x6b5   :  { %v3118_v30 = vunpack.i.h.bf16 %v3116_v28  ;;  %v3117_v31 = vunpack.i.l.bf16 %v3116_v28 }
 0x6b7   :  { %v727_v36 = vsel %vm223_vm2, %v557_v2, %v3118_v30  ;;  %v726_v37 = vsel %vm223_vm2, %v554_v1, %v3117_v31  ;;  %v3216_v1 = vld [vmem:[%s4058_s6] sm:$0xff]  }
 0x6b8   :  { %v3121_v32 = vpop.permute.xlu0 %3120 }
 0x6b9   :  { %v3123_v33 = vunpack.i.h.bf16 %v3121_v32  ;;  %v3122_v34 = vunpack.i.l.bf16 %v3121_v32 }
 0x6bb   :  { %v728_v56 = vsel %vm421_vm3, %v726_v37, %v3122_v34  ;;  %v729_v40 = vsel %vm421_vm3, %v727_v36, %v3123_v33  ;;  %v1002_v36 = vrot.slane %v3489_v29, %v1001_v25 }
 0x6bc   :  { %v3126_v35 = vpop.permute.xlu1 %3125  ;;  %v747_v53 = vpop.permute.xlu0 %746 }
 0x6bd   :  { %v3128_v38 = vunpack.i.h.bf16 %v3126_v35  ;;  %v3127_v39 = vunpack.i.l.bf16 %v3126_v35  ;;  %2895 = vmatpush3.bf16.msra.mxu0 %v747_v53 }
 0x6be   :  { %2908 = vmatprep.subr.bf16.mxu0 %v3382_v17 }
 0x6bf   :  { %v732_v49 = vsel %vm730_vm4, %v729_v40, %v3128_v38  ;;  %v731_v41 = vsel %vm730_vm4, %v728_v56, %v3127_v39 }
 0x6c0   :  { %v733_v43 = vpack.c.bf16 %v732_v49, %v731_v41 }
 0x6c2   :  { %2897 = vmatmul.mubr.msk.bf16.vlgmr.msra.gmra.mrb[16].mxu0 %vm54_vm0, %v733_v43 }
 0x6c3   :  { %2916 = vmatprep.mubr.msk.bf16.mxu0 %vm3383_vm1, %v3382_v17  ;;  %2909 = vmatpush3.bf16.msra.mxu0 %v3216_v1 }
 0x6c4   :  { %2910 = vmatprep.subr.bf16.mxu0 %v3382_v17 }
 0x6c7   :  { %2911 = vmatpush3.bf16.msra.mxu0 %v3217_v3 }
 0x6c8   :  { %2912 = vmatprep.subr.bf16.mxu0 %v3382_v17 }
 0x795   :  { %v787_v44 = vpop.f32.mrb[16].mxu0 }
 0x796   :  { %v3633_v45 = vadd.f32 %v787_v44, %v3463_v9  ;;  %v2898_v46 = vpop.f32.mrb[17].mxu0  ;;  %v3218_v44 = vld [vmem:[%s4058_s6 + $0x10] sm:$0xff]  }
 0x797   :  { %v790_v47 = vpop.f32.mrb[18].mxu0  ;;  %2913 = vmatpush3.bf16.msra.mxu0 %v3218_v44  ;;  %v3219_v46 = vld [vmem:[%s4058_s6 + $0x18] sm:$0xff]  }
 0x798   :  { %v3636_v48 = vadd.f32 %v790_v47, %v3469_v12  ;;  %v2899_v50 = vpop.f32.mrb[19].mxu0  ;;  %v796_v51 = vmul.f32 %v3633_v45, %v3633_v45  ;;  %v988_v12 = vsel %vm54_vm0, %v984_v55, 0.0  ;;  %2914 = vmatprep.subr.bf16.mxu0 %v3382_v17 }
 0x79a   :  { %v798_v52 = vsel %vm54_vm0, %v796_v51, 0.0  ;;  %v797_v54 = vmul.f32 %v3636_v48, %v3636_v48 }
 0x79b   :  { %799 = vadd.xlane.f32.xlu1 %v798_v52  ;;  %2915 = vmatpush3.bf16.msra.mxu0 %v3219_v46 }
 0x79c   :  { %v801_v9 = vsel %vm54_vm0, %v797_v54, 0.0  ;;  %2934 = vmatprep.subr.bf16.mxu0 %v3382_v17 }
 0x79d   :  { %802 = vadd.xlane.f32.xlu0 %v801_v9 }
 0x79f   :  { %989 = vadd.xlane.f32.xlu1 %v988_v12 }
 0x7a1   :  { %986 = vadd.xlane.f32.xlu0 %v985_v58 }
 0x7b0   :  { %1028 = vrot.lane.b32.xlu1 %v3208_v59, %s3387_s16 }
 0x7b4   :  { %1030 = vrot.lane.b32.xlu1 %v3211_v60, %s3387_s16 }
 0x7b7   :  { %1026 = vrot.lane.b32.xlu0 %v3210_v61, %s3387_s16 }
 0x7bb   :  { %1032 = vrot.lane.b32.xlu0 %v3213_v62, %s3387_s16 }
 0x828   :  { %v800_v2 = vpop.xlane.xlu1 %799 }
 0x829   :  { %v804_v4 = vmul.f32 0.03125, %v800_v2 }
 0x82a   :  { %v803_v5 = vpop.xlane.xlu0 %802 }
 0x82b   :  { %v806_v6 = vadd.f32 1e-06, %v804_v4  ;;  %v805_v7 = vmul.f32 0.03125, %v803_v5 }
 0x82c   :  { %v990_v11 = vpop.xlane.xlu1 %989 }
 0x82d   :  { %3260 = vrsqrt.f32 %v806_v6  ;;  %v807_v13 = vadd.f32 1e-06, %v805_v7  ;;  %v992_v14 = vmul.f32 0.03125, %v990_v11 }
 0x82e   :  { %v987_v15 = vpop.xlane.xlu0 %986 }
 0x82f   :  { %3262 = vrsqrt.f32 %v807_v13  ;;  %v994_v16 = vadd.f32 1e-06, %v992_v14  ;;  %v991_v18 = vmul.f32 0.03125, %v987_v15 }
 0x830   :  { %v1029_v28 = vpop.permute.xlu1 %1028 }
 0x831   :  { %3264 = vrsqrt.f32 %v994_v16  ;;  %v993_v19 = vadd.f32 1e-06, %v991_v18 }
 0x832   :  { %v1027_v30 = vpop.permute.xlu0 %1026 }
 0x833   :  { %3266 = vrsqrt.f32 %v993_v19  ;;  %v1035_v39 = vsel %vm914_vm5, %v1027_v30, %v1029_v28  ;;  %v1083_v30 = vld [vmem:[%s4054_s2] sm:$0xff] }
 0x834   :  { %v1031_v56 = vpop.permute.xlu1 %1030 }
 0x836   :  { %v1033_v40 = vpop.permute.xlu0 %1032 }
 0x837   :  { %v3261_v21 = vpop.eup %3260  ;;  %v1036_v43 = vsel %vm914_vm5, %v1031_v56, %v1033_v40  ;;  %v1087_v56 = vld [vmem:[%s4054_s2 + $0x20] sm:$0xff] }
 0x838   :  { %v810_v22 = vmul.f32 %v3261_v21, %v3633_v45 }
 0x839   :  { %v3263_v27 = vpop.eup %3262 }
 0x83a   :  { %v811_v31 = vmul.f32 %v3263_v27, %v3636_v48  ;;  %v816_v34 = vmul.f32 %v815_v23, %v810_v22 }
 0x83b   :  { %v3265_v32 = vpop.eup %3264 }
 0x83c   :  { %v998_v33 = vmul.f32 %v3265_v32, %v3465_v10  ;;  %v817_v35 = vmul.f32 %v815_v23, %v811_v31  ;;  %v1084_v32 = vld [vmem:[%s4054_s2 + $0x8] sm:$0xff] }
 0x83d   :  { %v3267_v37 = vpop.eup %3266 }
 0x83e   :  { %v997_v38 = vmul.f32 %v3267_v37, %v3461_v8  ;;  %v822_v53 = vpack.c.bf16 %v817_v35, %v816_v34  ;;  %v1004_v41 = vmul.f32 %v1002_v36, %v998_v33 }
 0x840   :  { %2905 = vmatmul.mubr.msk.bf16.vlgmr.msra.gmra.mrb[24].mxu1 %vm54_vm0, %v822_v53  ;;  %v1003_v49 = vmul.f32 %v1002_v36, %v997_v38  ;;  %v1085_v53 = vld [vmem:[%s4054_s2 + $0x10] sm:$0xff] }
 0x841   :  { %2921 = vmatpush3.bf16.msra.mxu1 %v1035_v39  ;;  %2924 = vmatprep.mubr.msk.bf16.mxu1 %vm3383_vm1, %v3382_v17 }
 0x842   :  { %2922 = vmatprep.subr.bf16.mxu1 %v3382_v17  ;;  %v1009_v29 = vpack.c.bf16 %v1004_v41, %v1003_v49  ;;  %v1086_v41 = vld [vmem:[%s4054_s2 + $0x18] sm:$0xff] }
 0x845   :  { %2923 = vmatpush3.bf16.msra.mxu1 %v1036_v43 }
 0x846   :  { %2928 = vmatprep.subr.bf16.mxu1 %v3382_v17 }
 0x848   :  { %2925 = vmatmul.mubr.msk.bf16.vlgmr.msra.gmra.mrb[28].mxu1 %vm54_vm0, %v1009_v29 }
 0x849   :  { %2930 = vmatprep.mubr.msk.bf16.mxu1 %vm3383_vm1, %v3382_v17 }
 0x913   :  { %v872_v47 = vpop.f32.mrb[24].mxu1 }
 0x914   :  { %v2906_v50 = vpop.f32.mrb[25].mxu1  ;;  %v879_v52 = vmax.f32 %v872_v47, 0.0 }
 0x915   :  { %v875_v51 = vpop.f32.mrb[26].mxu1 }
 0x916   :  { %v880_v54 = vmax.f32 %v875_v51, 0.0  ;;  %v2907_v55 = vpop.f32.mrb[27].mxu1 }
 0x918   :  { %v889_v9 = vpack.c.bf16 %v880_v54, %v879_v52 }
 0x91a   :  { %2917 = vmatmul.mubr.msk.bf16.vlgmr.msra.gmra.mrb[20].mxu0 %vm914_vm5, %v889_v9 }
 0x91b   :  { %v1076_v57 = vpop.f32.mrb[28].mxu1  ;;  %2936 = vmatprep.mubr.msk.bf16.mxu0 %vm3383_vm1, %v3382_v17 }
 0x91c   :  { %v2926_v12 = vpop.f32.mrb[29].mxu1 }
 0x91d   :  { %v1079_v58 = vpop.f32.mrb[30].mxu1  ;;  %v1089_v12 = vld [vmem:[%s4054_s2 + $0x30] sm:$0xff] }
 0x91e   :  { %v2927_v59 = vpop.f32.mrb[31].mxu1  ;;  %v3134_v60 = vpack.i.bf16 %v1079_v58, %v1076_v57  ;;  %v3711_v61 = vpack.c.bf16 %v1079_v58, %v1076_v57  ;;  %v1088_v57 = vld [vmem:[%s4054_s2 + $0x28] sm:$0xff] }
 0x920   :  { %3135 = vrot.lane.b32.xlu0 %v3134_v60, %s3384_s19  ;;  %3130 = vrot.lane.b32.xlu1 %v3134_v60, %s3385_s20 }
 0x924   :  { %3140 = vrot.lane.b32.xlu1 %v3134_v60, %s3386_s21  ;;  %1116 = vrot.lane.b32.xlu0 %v3711_v61, %s3381_s17 }
 0x992   :  { %v3136_v62 = vpop.permute.xlu0 %3135  ;;  %v3131_v42 = vpop.permute.xlu1 %3130 }
 0x993   :  { %v3138_v63 = vunpack.i.h.bf16 %v3136_v62  ;;  %v3137_v1 = vunpack.i.l.bf16 %v3136_v62  ;;  %v3133_v3 = vunpack.i.h.bf16 %v3131_v42  ;;  %v3132_v2 = vunpack.i.l.bf16 %v3131_v42  ;;  %v1090_v62 = vld [vmem:[%s4054_s2 + $0x38] sm:$0xff]  ;;  %s3391_s2 = smov 32  }
 0x995   :  { %v3718_v4 = vpack.c.bf16 %v3138_v63, %v3137_v1  ;;  %v3720_v5 = vpack.c.bf16 %v3133_v3, %v3132_v2 }
 0x996   :  { %v3141_v6 = vpop.permute.xlu1 %3140  ;;  %v1117_v7 = vpop.permute.xlu0 %1116 }
 0x997   :  { %v3143_v11 = vunpack.i.h.bf16 %v3141_v6  ;;  %v3142_v13 = vunpack.i.l.bf16 %v3141_v6  ;;  %v1122_v14 = vsel %vm223_vm2, %v1117_v7, 0  ;;  %1166 = vrot.lane.b32.xlu1 %v3720_v5, %s3381_s17  ;;  %1216 = vrot.lane.b32.xlu0 %v3718_v4, %s3381_s17 }
 0x998   :  { %2929 = vmatpush3.bf16.xpose.msra.mxu1 %v1122_v14 }
 0x999   :  { %v3727_v15 = vpack.c.bf16 %v3143_v11, %v3142_v13  ;;  %2940 = vmatprep.subr.bf16.mxu1 %v3382_v17 }
 0x99b   :  { %1266 = vrot.lane.b32.xlu1 %v3727_v15, %s3381_s17 }
 0x99f   :  { %2931 = vmatmul.mubr.msk.bf16.vlgmr.msra.gmra.mrb[32].mxu1 %vm223_vm2, %v3711_v61 }
 0x9a0   :  { %2942 = vmatprep.mubr.msk.bf16.mxu1 %vm3383_vm1, %v3382_v17 }
 0x9ed   :  { %v3736_v16 = vpop.f32.mrb[20].mxu0 }
 0x9ee   :  { %v2918_v18 = vpop.f32.mrb[21].mxu0 }
 0x9ef   :  { %v3738_v19 = vpop.f32.mrb[22].mxu0 }
 0x9f0   :  { %v2919_v20 = vpop.f32.mrb[23].mxu0 }
 0xa09   :  { %v1167_v21 = vpop.permute.xlu1 %1166  ;;  %v1217_v22 = vpop.permute.xlu0 %1216 }
 0xa0a   :  { %v1172_v23 = vsel %vm223_vm2, %v1167_v21, 0  ;;  %v1222_v25 = vsel %vm223_vm2, %v1217_v22, 0 }
 0xa0b   :  { %2935 = vmatpush3.bf16.xpose.msra.mxu0 %v1172_v23  ;;  %2941 = vmatpush3.bf16.xpose.msra.mxu1 %v1222_v25 }
 0xa0c   :  { %2946 = vmatprep.subr.bf16.mxu0 %v3382_v17  ;;  %2952 = vmatprep.subr.bf16.mxu1 %v3382_v17 }
 0xa0d   :  { %v1267_v27 = vpop.permute.xlu1 %1266 }
 0xa0e   :  { %v1272_v28 = vsel %vm223_vm2, %v1267_v27, 0 }
 0xa12   :  { %2937 = vmatmul.mubr.msk.bf16.vlgmr.msra.gmra.mrb[24].mxu0 %vm223_vm2, %v3720_v5  ;;  %2943 = vmatmul.mubr.msk.bf16.vlgmr.msra.gmra.mrb[36].mxu1 %vm223_vm2, %v3718_v4 }
 0xa13   :  { %2947 = vmatpush3.bf16.xpose.msra.mxu0 %v1272_v28  ;;  %2948 = vmatprep.mubr.msk.bf16.mxu0 %vm3383_vm1, %v3382_v17 }
 0xa14   :  { %2954 = vmatprep.mubr.msk.bf16.mxu1 %vm3383_vm1, %v3382_v17  ;;  %2958 = vmatprep.subr.bf16.mxu0 %v3382_v17 }
 0xa1a   :  { %2949 = vmatmul.mubr.msk.bf16.vlgmr.msra.gmra.mrb[28].mxu0 %vm223_vm2, %v3727_v15 }
 0xa1b   :  { %2960 = vmatprep.mubr.msk.bf16.mxu0 %vm3383_vm1, %v3382_v17 }
 0xa72   :  { %v1158_v31 = vpop.f32.mrb[32].mxu1 }
 0xa73   :  { %v1159_v33 = vadd.f32 %v1158_v31, %v1083_v30  ;;  %v2932_v34 = vpop.f32.mrb[33].mxu1 }
 0xa74   :  { %v1161_v35 = vpop.f32.mrb[34].mxu1 }
 0xa75   :  { %v1162_v36 = vadd.f32 %v1161_v35, %v1084_v32  ;;  %v2933_v37 = vpop.f32.mrb[35].mxu1  ;;  %v1315_v38 = vsel %vm421_vm3, %v1159_v33, -inf }
 0xa76   :  { %1316 = vmax.xlane.f32.xlu0 %v1315_v38 }
 0xa77   :  { %v1318_v39 = vsel %vm421_vm3, %v1162_v36, -inf }
 0xa78   :  { %1319 = vmax.xlane.f32.xlu1 %v1318_v39 }
 0xae5   :  { %v1208_v40 = vpop.f32.mrb[24].mxu0  ;;  %v1258_v49 = vpop.f32.mrb[36].mxu1 }
 0xae6   :  { %v1209_v43 = vadd.f32 %v1208_v40, %v1085_v53  ;;  %v1259_v29 = vadd.f32 %v1258_v49, %v1087_v56  ;;  %v2938_v44 = vpop.f32.mrb[25].mxu0  ;;  %v2944_v46 = vpop.f32.mrb[37].mxu1 }
 0xae7   :  { %v1211_v47 = vpop.f32.mrb[26].mxu0  ;;  %v1261_v50 = vpop.f32.mrb[38].mxu1 }
 0xae8   :  { %v1212_v51 = vadd.f32 %v1211_v47, %v1086_v41  ;;  %v2939_v52 = vpop.f32.mrb[27].mxu0  ;;  %v2945_v54 = vpop.f32.mrb[39].mxu1  ;;  %v1321_v55 = vsel %vm421_vm3, %v1209_v43, -inf  ;;  %v1327_v9 = vsel %vm421_vm3, %v1259_v29, -inf  ;;  %v1262_v58 = vadd.f32 %v1261_v50, %v1088_v57 }
 0xae9   :  { %1322 = vmax.xlane.f32.xlu0 %v1321_v55  ;;  %1328 = vmax.xlane.f32.xlu1 %v1327_v9 }
 0xaea   :  { %v1324_v59 = vsel %vm421_vm3, %v1212_v51, -inf  ;;  %v1330_v7 = vsel %vm421_vm3, %v1262_v58, -inf }
 0xaed   :  { %v1308_v60 = vpop.f32.mrb[28].mxu0  ;;  %1325 = vmax.xlane.f32.xlu0 %v1324_v59 }
 0xaee   :  { %v1309_v42 = vadd.f32 %v1308_v60, %v1089_v12  ;;  %v2950_v63 = vpop.f32.mrb[29].mxu0 }
 0xaef   :  { %v1311_v1 = vpop.f32.mrb[30].mxu0 }
 0xaf0   :  { %v1312_v3 = vadd.f32 %v1311_v1, %v1090_v62  ;;  %v2951_v2 = vpop.f32.mrb[31].mxu0  ;;  %v1333_v6 = vsel %vm421_vm3, %v1309_v42, -inf }
 0xaf1   :  { %1334 = vmax.xlane.f32.xlu1 %v1333_v6  ;;  %1331 = vmax.xlane.f32.xlu0 %v1330_v7 }
 0xaf2   :  { %v1336_v11 = vsel %vm421_vm3, %v1312_v3, -inf }
 0xaf5   :  { %1337 = vmax.xlane.f32.xlu0 %v1336_v11 }
 0xb02   :  { %1407 = vrot.lane.b32.xlu1 %v3711_v61, %s3387_s16 }
 0xb03   :  { %v1317_v20 = vpop.xlane.xlu0 %1316 }
 0xb04   :  { %v1339_v21 = vsub.f32 %v1159_v33, %v1317_v20 }
 0xb05   :  { %v1320_v13 = vpop.xlane.xlu1 %1319 }
 0xb06   :  { %v1340_v14 = vsub.f32 %v1162_v36, %v1320_v13  ;;  %v1347_v23 = vmul.f32 1.442695, %v1339_v21 }
 0xb08   :  { %v1349_v18 = vmul.f32 1.442695, %v1340_v14 }
 0xb0a   :  { %3268 = vpow2.f32 %v1349_v18 }
 0xb0b   :  { %3270 = vpow2.f32 %v1347_v23 }
 0xb14   :  { %v3269_v22 = vpop.eup %3268 }
 0xb15   :  { %v1366_v25 = vsel %vm421_vm3, %v3269_v22, 0.0  ;;  %v3271_v27 = vpop.eup %3270 }
 0xb16   :  { %1367 = vadd.xlane.f32.xlu0 %v1366_v25  ;;  %v1363_v28 = vsel %vm421_vm3, %v3271_v27, 0.0 }
 0xb26   :  { %1364 = vadd.xlane.f32.xlu1 %v1363_v28 }
 0xb76   :  { %v1323_v30 = vpop.xlane.xlu0 %1322  ;;  %v1329_v31 = vpop.xlane.xlu1 %1328 }
 0xb77   :  { %v1341_v32 = vsub.f32 %v1209_v43, %v1323_v30  ;;  %v1343_v61 = vsub.f32 %v1259_v29, %v1329_v31 }
 0xb79   :  { %v1351_v34 = vmul.f32 1.442695, %v1341_v32  ;;  %v1355_v35 = vmul.f32 1.442695, %v1343_v61 }
 0xb7a   :  { %v1326_v36 = vpop.xlane.xlu0 %1325 }
 0xb7b   :  { %3272 = vpow2.f32 %v1351_v34  ;;  %v1342_v37 = vsub.f32 %v1212_v51, %v1326_v36 }
 0xb7c   :  { %3274 = vpow2.f32 %v1355_v35 }
 0xb7d   :  { %v1353_v33 = vmul.f32 1.442695, %v1342_v37 }
 0xb7e   :  { %v1335_v38 = vpop.xlane.xlu1 %1334  ;;  %v1332_v39 = vpop.xlane.xlu0 %1331 }
 0xb7f   :  { %3276 = vpow2.f32 %v1353_v33  ;;  %v1345_v53 = vsub.f32 %v1309_v42, %v1335_v38  ;;  %v1344_v56 = vsub.f32 %v1262_v58, %v1332_v39 }
 0xb81   :  { %v1359_v40 = vmul.f32 1.442695, %v1345_v53  ;;  %v1357_v49 = vmul.f32 1.442695, %v1344_v56 }
 0xb82   :  { %v1408_v41 = vpop.permute.xlu1 %1407  ;;  %v1338_v44 = vpop.xlane.xlu0 %1337 }
 0xb83   :  { %3278 = vpow2.f32 %v1359_v40  ;;  %v1346_v46 = vsub.f32 %v1312_v3, %v1338_v44  ;;  %2953 = vmatpush3.bf16.msra.mxu1 %v1408_v41 }
 0xb84   :  { %3280 = vpow2.f32 %v1357_v49  ;;  %2964 = vmatprep.subr.bf16.mxu1 %v3382_v17 }
 0xb85   :  { %v3273_v43 = vpop.eup %3272  ;;  %v1361_v29 = vmul.f32 1.442695, %v1346_v46 }
 0xb86   :  { %v1369_v47 = vsel %vm421_vm3, %v3273_v43, 0.0  ;;  %v3275_v50 = vpop.eup %3274 }
 0xb87   :  { %3282 = vpow2.f32 %v1361_v29  ;;  %1370 = vadd.xlane.f32.xlu1 %v1369_v47  ;;  %v1375_v52 = vsel %vm421_vm3, %v3275_v50, 0.0 }
 0xb89   :  { %v3277_v51 = vpop.eup %3276 }
 0xb8a   :  { %v1372_v54 = vsel %vm421_vm3, %v3277_v51, 0.0 }
 0xb8b   :  { %1376 = vadd.xlane.f32.xlu1 %v1375_v52  ;;  %1373 = vadd.xlane.f32.xlu0 %v1372_v54 }
 0xb8d   :  { %v3279_v55 = vpop.eup %3278 }
 0xb8e   :  { %v3281_v9 = vpop.eup %3280  ;;  %v1381_v57 = vsel %vm421_vm3, %v3279_v55, 0.0 }
 0xb8f   :  { %1382 = vadd.xlane.f32.xlu1 %v1381_v57  ;;  %v1378_v12 = vsel %vm421_vm3, %v3281_v9, 0.0  ;;  %v3830_v57 = vadd.f32 %v3738_v19, %v3636_v48 }
 0xb90   :  { %1379 = vadd.xlane.f32.xlu0 %v1378_v12 }
 0xb91   :  { %v3283_v58 = vpop.eup %3282  ;;  %v962_v12 = vmul.f32 %v3830_v57, %v3830_v57 }
 0xb92   :  { %v1384_v59 = vsel %vm421_vm3, %v3283_v58, 0.0 }
 0xb94   :  { %1385 = vadd.xlane.f32.xlu0 %v1384_v59  ;;  %v966_v59 = vsel %vm54_vm0, %v962_v12, 0.0 }
 0xba0   :  { %1501 = vrot.lane.b32.xlu1 %v3718_v4, %s3387_s16 }
 0xba3   :  { %v1368_v60 = vpop.xlane.xlu0 %1367 }
 0xba4   :  { %1548 = vrot.lane.b32.xlu1 %v3727_v15, %s3387_s16  ;;  %3284 = vrcp.f32 %v1368_v60 }
 0xbaa   :  { %1454 = vrot.lane.b32.xlu0 %v3720_v5, %s3387_s16 }
 0xbae   :  { %v3285_v42 = vpop.eup %3284  ;;  %1626 = vrot.lane.b32.xlu0 %v3607_v0, %s3391_s2 }
 0xbaf   :  { %v1396_v1 = vmul.f32 %v3285_v42, %v3269_v22 }
 0xbb3   :  { %v1365_v62 = vpop.xlane.xlu1 %1364 }
 0xbb4   :  { %3286 = vrcp.f32 %v1365_v62 }
 0xbbe   :  { %v3287_v63 = vpop.eup %3286 }
 0xbbf   :  { %v1395_v3 = vmul.f32 %v3287_v63, %v3271_v27 }
 0xbc1   :  { %v1403_v2 = vpack.c.bf16 %v1396_v1, %v1395_v3 }
 0xbc3   :  { %2955 = vmatmul.mubr.msk.bf16.vlgmr.msra.gmra.mrb[40].mxu1 %vm421_vm3, %v1403_v2 }
 0xbc4   :  { %2966 = vmatprep.mubr.msk.bf16.mxu1 %vm3383_vm1, %v3382_v17 }
 0xc14   :  { %v1371_v4 = vpop.xlane.xlu1 %1370 }
 0xc15   :  { %3288 = vrcp.f32 %v1371_v4 }
 0xc18   :  { %v1377_v15 = vpop.xlane.xlu1 %1376  ;;  %v1374_v6 = vpop.xlane.xlu0 %1373 }
 0xc19   :  { %3290 = vrcp.f32 %v1374_v6 }
 0xc1a   :  { %3292 = vrcp.f32 %v1377_v15 }
 0xc1c   :  { %v1383_v5 = vpop.xlane.xlu1 %1382 }
 0xc1d   :  { %v1380_v7 = vpop.xlane.xlu0 %1379 }
 0xc1e   :  { %3294 = vrcp.f32 %v1380_v7 }
 0xc1f   :  { %3296 = vrcp.f32 %v1383_v5  ;;  %v3289_v14 = vpop.eup %3288 }
 0xc20   :  { %v1502_v11 = vpop.permute.xlu1 %1501  ;;  %v1397_v20 = vmul.f32 %v3289_v14, %v3273_v43 }
 0xc21   :  { %v1386_v13 = vpop.xlane.xlu0 %1385  ;;  %2965 = vmatpush3.bf16.msra.mxu1 %v1502_v11 }
 0xc22   :  { %3298 = vrcp.f32 %v1386_v13  ;;  %2976 = vmatprep.subr.bf16.mxu1 %v3382_v17 }
 0xc23   :  { %v3291_v18 = vpop.eup %3290 }
 0xc24   :  { %v1398_v21 = vmul.f32 %v3291_v18, %v3277_v51  ;;  %v3293_v23 = vpop.eup %3292  ;;  %v1549_v31 = vpop.permute.xlu1 %1548 }
 0xc25   :  { %v1455_v22 = vpop.permute.xlu0 %1454  ;;  %v1399_v28 = vmul.f32 %v3293_v23, %v3275_v50 }
 0xc26   :  { %2959 = vmatpush3.bf16.msra.mxu0 %v1455_v22  ;;  %v1404_v25 = vpack.c.bf16 %v1398_v21, %v1397_v20 }
 0xc27   :  { %2970 = vmatprep.subr.bf16.mxu0 %v3382_v17 }
 0xc28   :  { %v3295_v27 = vpop.eup %3294 }
 0xc29   :  { %v1400_v30 = vmul.f32 %v3295_v27, %v3281_v9  ;;  %2961 = vmatmul.mubr.msk.bf16.vlgmr.msra.gmra.mrb[32].mxu0 %vm421_vm3, %v1404_v25  ;;  %v3297_v32 = vpop.eup %3296  ;;  %v1627_v56 = vpop.permute.xlu0 %1626 }
 0xc2a   :  { %2971 = vmatpush3.bf16.msra.mxu0 %v1549_v31  ;;  %2972 = vmatprep.mubr.msk.bf16.mxu0 %vm3383_vm1, %v3382_v17  ;;  %v1401_v35 = vmul.f32 %v3297_v32, %v3279_v55 }
 0xc2b   :  { %v1405_v61 = vpack.c.bf16 %v1400_v30, %v1399_v28  ;;  %2984 = vmatprep.subr.bf16.mxu0 %v3382_v17 }
 0xc2c   :  { %v3299_v34 = vpop.eup %3298 }
 0xc2d   :  { %v1402_v36 = vmul.f32 %v3299_v34, %v3283_v58  ;;  %2967 = vmatmul.mubr.msk.bf16.vlgmr.msra.gmra.mrb[44].mxu1 %vm421_vm3, %v1405_v61  ;;  %v959_v58 = vadd.f32 %v3736_v16, %v3633_v45 }
 0xc2e   :  { %2980 = vmatprep.mubr.msk.bf16.mxu1 %vm3383_vm1, %v3382_v17  ;;  %2977 = vmatpush3.bf16.msra.mxu1 %v1627_v56 }
 0xc2f   :  { %v1406_v37 = vpack.c.bf16 %v1402_v36, %v1401_v35  ;;  %2978 = vmatprep.subr.bf16.mxu1 %v3382_v17  ;;  %v961_v60 = vmul.f32 %v959_v58, %v959_v58 }
 0xc31   :  { %2973 = vmatmul.mubr.msk.bf16.vlgmr.msra.gmra.mrb[36].mxu0 %vm421_vm3, %v1406_v37  ;;  %v963_v62 = vsel %vm54_vm0, %v961_v60, 0.0 }
 0xc32   :  { %2988 = vmatprep.mubr.msk.bf16.mxu0 %vm3383_vm1, %v3382_v17 }
 0xc96   :  { %v1447_v33 = vpop.f32.mrb[40].mxu1 }
 0xc97   :  { %v2956_v38 = vpop.f32.mrb[41].mxu1 }
 0xc98   :  { %v1450_v39 = vpop.f32.mrb[42].mxu1 }
 0xc99   :  { %v2957_v53 = vpop.f32.mrb[43].mxu1 }
 0xcfc   :  { %v1494_v40 = vpop.f32.mrb[32].mxu0 }
 0xcfd   :  { %v2962_v49 = vpop.f32.mrb[33].mxu0 }
 0xcfe   :  { %v1497_v41 = vpop.f32.mrb[34].mxu0 }
 0xcff   :  { %v3144_v44 = vpack.i.bf16 %v1497_v41, %v1494_v40  ;;  %v2963_v46 = vpop.f32.mrb[35].mxu0 }
 0xd00   :  { %v1541_v43 = vpop.f32.mrb[44].mxu1 }
 0xd01   :  { %3145 = vrot.lane.b32.xlu1 %v3144_v44, %s3388_s18  ;;  %v2968_v29 = vpop.f32.mrb[45].mxu1 }
 0xd02   :  { %v1544_v47 = vpop.f32.mrb[46].mxu1  ;;  %v3875_v29 = vld [vmem:[%s4059_s7] sm:$0xff] }
 0xd03   :  { %v3149_v50 = vpack.i.bf16 %v1544_v47, %v1541_v43  ;;  %v2969_v0 = vpop.f32.mrb[47].mxu1 }
 0xd04   :  { %v1588_v51 = vpop.f32.mrb[36].mxu0 }
 0xd05   :  { %v2974_v52 = vpop.f32.mrb[37].mxu0  ;;  %3150 = vrot.lane.b32.xlu0 %v3149_v50, %s3389_s22 }
 0xd06   :  { %v1591_v54 = vpop.f32.mrb[38].mxu0 }
 0xd07   :  { %v3154_v55 = vpack.i.bf16 %v1591_v54, %v1588_v51  ;;  %v2975_v9 = vpop.f32.mrb[39].mxu0 }
 0xd08   :  { %v1696_v9 = vsub.s32 4, %v3483_v26 }
 0xd09   :  { %3155 = vrot.lane.b32.xlu1 %v3154_v55, %s3390_s25  ;;  %1628 = vrot.lane.b32.xlu0 %v3617_v24, %s3391_s2  ;;  %v3220_v24 = vld [vmem:[%s4057_s5 + $0x30] ss:$20 sps:$4 sm:$0xff]   ;;  %s3393_s2 = smov [#allocation2]  }
 0xd0a   :  { %s2672_s30 = sshll.u32 %s3393_s2, 4  ;;  %s2673_s30 = int_to_ptr.vmem [resolvable:$true] %s2672_s30 }
 0xd0b   :  { %s3357_s9 = scalar_lea.vmem %s2673_s30, 32  ;;  %p3362_p1 = scmp.lt.s32.totalorder %s2673_s30, %s2673_s30 }
 0xd0c   :  { %p3358_p0 = scmp.ne.s32.totalorder %s2673_s30, %s3357_s9  ;;  %p3363_p2 = scmp.lt.s32.totalorder %s3357_s9, %s3357_s9 }
 0xd0e   :  { %p3364_p3 = por %p3363_p2, %p3362_p1 }
 0xd10   :  { %p3365_p4 = pnand %p3364_p3, %p3358_p0 }
 0xd28   :  { %967 = vadd.xlane.f32.xlu0 %v966_v59 }
 0xd2d   :  { %964 = vadd.xlane.f32.xlu1 %v963_v62 }
 0xd3e   :  { %1768 = vrot.lane.b32.xlu1 %v3220_v24, %s3387_s16 }
 0xd73   :  { %v3146_v48 = vpop.permute.xlu1 %3145 }
 0xd74   :  { %v3148_v42 = vunpack.i.h.bf16 %v3146_v48  ;;  %v3147_v63 = vunpack.i.l.bf16 %v3146_v48 }
 0xd76   :  { %v1619_v2 = vsel %vm223_vm2, %v1447_v33, %v3147_v63  ;;  %v1620_v4 = vsel %vm223_vm2, %v1450_v39, %v3148_v42  ;;  %v979_v39 = vsub.s32 2, %v3483_v26 }
 0xd77   :  { %v3151_v19 = vpop.permute.xlu0 %3150 }
 0xd78   :  { %v3153_v1 = vunpack.i.h.bf16 %v3151_v19  ;;  %v3152_v3 = vunpack.i.l.bf16 %v3151_v19  ;;  %v980_v47 = vrot.slane %v3875_v29, %v979_v39 }
 0xd7a   :  { %v1622_v5 = vsel %vm421_vm3, %v1620_v4, %v3153_v1  ;;  %v1621_v7 = vsel %vm421_vm3, %v1619_v2, %v3152_v3 }
 0xd7b   :  { %v3156_v45 = vpop.permute.xlu1 %3155  ;;  %v1629_v16 = vpop.permute.xlu0 %1628 }
 0xd7c   :  { %v3158_v15 = vunpack.i.h.bf16 %v3156_v45  ;;  %v3157_v6 = vunpack.i.l.bf16 %v3156_v45  ;;  %2979 = vmatpush3.bf16.msra.mxu1 %v1629_v16 }
 0xd7d   :  { %2992 = vmatprep.subr.bf16.mxu1 %v3382_v17 }
 0xd7e   :  { %v1623_v11 = vsel %vm730_vm4, %v1621_v7, %v3157_v6  ;;  %v1624_v13 = vsel %vm730_vm4, %v1622_v5, %v3158_v15 }
 0xd7f   :  { %v1625_v14 = vpack.c.bf16 %v1624_v13, %v1623_v11 }
 0xd81   :  { %2981 = vmatmul.mubr.msk.bf16.vlgmr.msra.gmra.mrb[48].mxu1 %vm54_vm0, %v1625_v14 }
 0xd82   :  { %2996 = vmatprep.mubr.msk.bf16.mxu1 %vm3383_vm1, %v3382_v17 }
 0xdb5   :  { %v968_v32 = vpop.xlane.xlu0 %967 }
 0xdb6   :  { %v970_v34 = vmul.f32 0.03125, %v968_v32 }
 0xdb8   :  { %v972_v36 = vadd.f32 1e-06, %v970_v34 }
 0xe54   :  { %v1669_v18 = vpop.f32.mrb[48].mxu1 }
 0xe55   :  { %v3853_v20 = vadd.f32 %v3461_v8, %v1669_v18  ;;  %v2982_v21 = vpop.f32.mrb[49].mxu1  ;;  %v3221_v8 = vld [vmem:[%s4057_s5 + $0x8] ss:$20 sps:$4 sm:$0xff]  }
 0xe56   :  { %v1672_v22 = vpop.f32.mrb[50].mxu1 }
 0xe57   :  { %v3856_v23 = vadd.f32 %v3465_v10, %v1672_v22  ;;  %v2983_v25 = vpop.f32.mrb[51].mxu1  ;;  %v1678_v27 = vmul.f32 %v3853_v20, %v3853_v20  ;;  %v965_v10 = vpop.xlane.xlu1 %964 }
 0xe58   :  { %v969_v61 = vmul.f32 0.03125, %v965_v10 }
 0xe59   :  { %v1680_v28 = vsel %vm54_vm0, %v1678_v27, 0.0  ;;  %v1679_v30 = vmul.f32 %v3856_v23, %v3856_v23 }
 0xe5a   :  { %1681 = vadd.xlane.f32.xlu0 %v1680_v28  ;;  %v971_v35 = vadd.f32 1e-06, %v969_v61 }
 0xe5b   :  { %v1683_v31 = vsel %vm54_vm0, %v1679_v30, 0.0  ;;  %v1769_v37 = vpop.permute.xlu1 %1768 }
 0xe5c   :  { %1684 = vadd.xlane.f32.xlu1 %v1683_v31  ;;  %3300 = vrsqrt.f32 %v971_v35 }
 0xe5d   :  { %3302 = vrsqrt.f32 %v972_v36 }
 0xe66   :  { %v3301_v33 = vpop.eup %3300 }
 0xe67   :  { %v3303_v53 = vpop.eup %3302  ;;  %v975_v40 = vmul.f32 %v3301_v33, %v959_v58  ;;  %v1697_v58 = vrot.slane %v3875_v29, %v1696_v9 }
 0xe68   :  { %v976_v46 = vmul.f32 %v3303_v53, %v3830_v57 }
 0xe69   :  { %v981_v0 = vmul.f32 %v980_v47, %v975_v40 }
 0xe6a   :  { %v982_v52 = vmul.f32 %v980_v47, %v976_v46 }
 0xe6c   :  { %v1765_v55 = vpack.c.bf16 %v982_v52, %v981_v0 }
 0xe6d   :  { %1715 = vrot.lane.b32.xlu1 %v3221_v8, %s3381_s17 }
 0xe70   :  { %1766 = vrot.lane.b32.xlu0 %v3221_v8, %s3387_s16 }
 0xe74   :  { %1717 = vrot.lane.b32.xlu0 %v3220_v24, %s3381_s17 }
 0xee7   :  { %v1682_v38 = vpop.xlane.xlu0 %1681 }
 0xee8   :  { %v1686_v56 = vmul.f32 0.03125, %v1682_v38 }
 0xee9   :  { %v1685_v49 = vpop.xlane.xlu1 %1684 }
 0xeea   :  { %v1688_v41 = vadd.f32 1e-06, %v1686_v56  ;;  %v1687_v44 = vmul.f32 0.03125, %v1685_v49 }
 0xeeb   :  { %v1767_v43 = vpop.permute.xlu0 %1766 }
 0xeec   :  { %3304 = vrsqrt.f32 %v1688_v41  ;;  %v1689_v50 = vadd.f32 1e-06, %v1687_v44  ;;  %2993 = vmatpush3.bf16.msra.mxu1 %v1767_v43  ;;  %v1820_v44 = vld [vmem:[%s4055_s3] sm:$0xff]  ;;  %v1821_v43 = vld [vmem:[%s4055_s3 + $0x8] sm:$0xff] }
 0xeed   :  { %2994 = vmatprep.subr.bf16.mxu1 %v3382_v17  ;;  %v1716_v51 = vpop.permute.xlu1 %1715 }
 0xeee   :  { %3306 = vrsqrt.f32 %v1689_v50  ;;  %2985 = vmatpush3.bf16.msra.mxu0 %v1716_v51 }
 0xeef   :  { %v1718_v54 = vpop.permute.xlu0 %1717  ;;  %2986 = vmatprep.subr.bf16.mxu0 %v3382_v17 }
 0xef0   :  { %2995 = vmatpush3.bf16.msra.mxu1 %v1769_v37 }
 0xef1   :  { %3006 = vmatprep.subr.bf16.mxu1 %v3382_v17 }
 0xef2   :  { %2987 = vmatpush3.bf16.msra.mxu0 %v1718_v54 }
 0xef3   :  { %2997 = vmatmul.mubr.msk.bf16.vlgmr.msra.gmra.mrb[52].mxu1 %vm54_vm0, %v1765_v55  ;;  %3000 = vmatprep.subr.bf16.mxu0 %v3382_v17 }
 0xef4   :  { %3008 = vmatprep.mubr.msk.bf16.mxu1 %vm3383_vm1, %v3382_v17 }
 0xef6   :  { %v3305_v57 = vpop.eup %3304 }
 0xef7   :  { %v1692_v12 = vmul.f32 %v3305_v57, %v3853_v20 }
 0xef8   :  { %v3307_v59 = vpop.eup %3306 }
 0xef9   :  { %v1693_v60 = vmul.f32 %v3307_v59, %v3856_v23  ;;  %v1698_v62 = vmul.f32 %v1697_v58, %v1692_v12 }
 0xefb   :  { %v1699_v24 = vmul.f32 %v1697_v58, %v1693_v60 }
 0xefd   :  { %v1704_v48 = vpack.c.bf16 %v1699_v24, %v1698_v62 }
 0xeff   :  { %2989 = vmatmul.mubr.msk.bf16.vlgmr.msra.gmra.mrb[40].mxu0 %vm54_vm0, %v1704_v48 }
 0xf00   :  { %3002 = vmatprep.mubr.msk.bf16.mxu0 %vm3383_vm1, %v3382_v17 }
 0xfc6   :  { %v1809_v19 = vpop.f32.mrb[52].mxu1 }
 0xfc7   :  { %v2998_v42 = vpop.f32.mrb[53].mxu1 }
 0xfc8   :  { %v1812_v63 = vpop.f32.mrb[54].mxu1 }
 0xfc9   :  { %v2999_v1 = vpop.f32.mrb[55].mxu1  ;;  %v3164_v3 = vpack.i.bf16 %v1812_v63, %v1809_v19  ;;  %v3892_v45 = vpack.c.bf16 %v1812_v63, %v1809_v19 }
 0xfcb   :  { %3165 = vrot.lane.b32.xlu0 %v3164_v3, %s3384_s19  ;;  %3160 = vrot.lane.b32.xlu1 %v3164_v3, %s3385_s20  ;;  %v1874_v16 = vsel %vm223_vm2, %v3892_v45, 0 }
 0xfcc   :  { %3001 = vmatpush3.bf16.xpose.msra.mxu0 %v1874_v16 }
 0xfcd   :  { %3012 = vmatprep.subr.bf16.mxu0 %v3382_v17 }
 0xfcf   :  { %3175 = vrot.lane.b32.xlu0 %v3164_v3, %s3386_s21 }
 0xfd2   :  { %v1758_v2 = vpop.f32.mrb[40].mxu0 }
 0xfd3   :  { %v2990_v4 = vpop.f32.mrb[41].mxu0 }
 0xfd4   :  { %v1761_v15 = vpop.f32.mrb[42].mxu0 }
 0xfd5   :  { %v1862_v6 = vpack.c.bf16 %v1761_v15, %v1758_v2  ;;  %v2991_v5 = vpop.f32.mrb[43].mxu0  ;;  %v3184_v7 = vpack.i.bf16 %v1761_v15, %v1758_v2 }
 0xfd7   :  { %3185 = vrot.lane.b32.xlu0 %v3184_v7, %s3386_s21  ;;  %3170 = vrot.lane.b32.xlu1 %v3184_v7, %s3385_s20 }
 0xfd8   :  { %3003 = vmatmul.mubr.msk.bf16.vlgmr.msra.gmra.mrb[44].mxu0 %vm223_vm2, %v1862_v6 }
 0xfd9   :  { %3014 = vmatprep.mubr.msk.bf16.mxu0 %vm3383_vm1, %v3382_v17 }
 0xfdb   :  { %3180 = vrot.lane.b32.xlu1 %v3184_v7, %s3384_s19 }
0x103d   :  { %v3166_v11 = vpop.permute.xlu0 %3165  ;;  %v3161_v13 = vpop.permute.xlu1 %3160 }
0x103e   :  { %v3168_v14 = vunpack.i.h.bf16 %v3166_v11  ;;  %v3167_v18 = vunpack.i.l.bf16 %v3166_v11  ;;  %v3163_v21 = vunpack.i.h.bf16 %v3161_v13  ;;  %v3162_v22 = vunpack.i.l.bf16 %v3161_v13 }
0x1040   :  { %v3906_v25 = vpack.c.bf16 %v3168_v14, %v3167_v18  ;;  %v3908_v27 = vpack.c.bf16 %v3163_v21, %v3162_v22 }
0x1041   :  { %v3176_v31 = vpop.permute.xlu0 %3175 }
0x1042   :  { %v1921_v28 = vsel %vm223_vm2, %v3908_v27, 0  ;;  %v1968_v30 = vsel %vm223_vm2, %v3906_v25, 0  ;;  %v3178_v8 = vunpack.i.h.bf16 %v3176_v31  ;;  %v3177_v10 = vunpack.i.l.bf16 %v3176_v31 }
0x1043   :  { %3007 = vmatpush3.bf16.xpose.msra.mxu1 %v1921_v28  ;;  %3013 = vmatpush3.bf16.xpose.msra.mxu0 %v1968_v30 }
0x1044   :  { %3018 = vmatprep.subr.bf16.mxu1 %v3382_v17  ;;  %3024 = vmatprep.subr.bf16.mxu0 %v3382_v17  ;;  %v3916_v61 = vpack.c.bf16 %v3178_v8, %v3177_v10 }
0x1046   :  { %v2015_v53 = vsel %vm223_vm2, %v3916_v61, 0 }
0x1049   :  { %v3171_v32 = vpop.permute.xlu1 %3170  ;;  %v3186_v37 = vpop.permute.xlu0 %3185 }
0x104a   :  { %v3173_v34 = vunpack.i.h.bf16 %v3171_v32  ;;  %v3172_v35 = vunpack.i.l.bf16 %v3171_v32  ;;  %v3188_v56 = vunpack.i.h.bf16 %v3186_v37  ;;  %v3187_v40 = vunpack.i.l.bf16 %v3186_v37 }
0x104c   :  { %v1863_v36 = vpack.c.bf16 %v3173_v34, %v3172_v35  ;;  %v1865_v41 = vpack.c.bf16 %v3188_v56, %v3187_v40 }
0x104d   :  { %v3181_v33 = vpop.permute.xlu1 %3180 }
0x104e   :  { %v3183_v38 = vunpack.i.h.bf16 %v3181_v33  ;;  %v3182_v39 = vunpack.i.l.bf16 %v3181_v33  ;;  %3009 = vmatmul.mubr.msk.bf16.vlgmr.msra.gmra.mrb[56].mxu1 %vm223_vm2, %v1863_v36 }
0x104f   :  { %3019 = vmatpush3.bf16.xpose.msra.mxu1 %v2015_v53  ;;  %3020 = vmatprep.mubr.msk.bf16.mxu1 %vm3383_vm1, %v3382_v17 }
0x1050   :  { %v1864_v49 = vpack.c.bf16 %v3183_v38, %v3182_v39  ;;  %3030 = vmatprep.subr.bf16.mxu1 %v3382_v17 }
0x1052   :  { %3015 = vmatmul.mubr.msk.bf16.vlgmr.msra.gmra.mrb[48].mxu0 %vm223_vm2, %v1864_v49 }
0x1053   :  { %3026 = vmatprep.mubr.msk.bf16.mxu0 %vm3383_vm1, %v3382_v17 }
0x1056   :  { %3021 = vmatmul.mubr.msk.bf16.vlgmr.msra.gmra.mrb[60].mxu1 %vm223_vm2, %v1865_v41 }
0x1057   :  { %3032 = vmatprep.mubr.msk.bf16.mxu1 %vm3383_vm1, %v3382_v17 }
0x10ab   :  { %v1910_v46 = vpop.f32.mrb[44].mxu0 }
0x10ac   :  { %v1911_v47 = vadd.f32 %v1910_v46, %v1820_v44  ;;  %v3004_v50 = vpop.f32.mrb[45].mxu0 }
0x10ad   :  { %v1913_v0 = vpop.f32.mrb[46].mxu0 }
0x10ae   :  { %v1914_v51 = vadd.f32 %v1913_v0, %v1821_v43  ;;  %v3005_v52 = vpop.f32.mrb[47].mxu0  ;;  %v2058_v54 = vsel %vm421_vm3, %v1911_v47, -inf }
0x10af   :  { %2059 = vmax.xlane.f32.xlu1 %v2058_v54 }
0x10b0   :  { %v2061_v55 = vsel %vm421_vm3, %v1914_v51, -inf }
0x10b1   :  { %2062 = vmax.xlane.f32.xlu0 %v2061_v55 }
0x1121   :  { %v1957_v9 = vpop.f32.mrb[56].mxu1 }
0x1122   :  { %v1958_v57 = vadd.f32 %v1957_v9, %v1820_v44  ;;  %v3010_v12 = vpop.f32.mrb[57].mxu1 }
0x1123   :  { %v1960_v58 = vpop.f32.mrb[58].mxu1 }
0x1124   :  { %v1961_v59 = vadd.f32 %v1960_v58, %v1821_v43  ;;  %v3011_v60 = vpop.f32.mrb[59].mxu1  ;;  %v2064_v62 = vsel %vm421_vm3, %v1958_v57, -inf }
0x1125   :  { %v2004_v24 = vpop.f32.mrb[48].mxu0  ;;  %2065 = vmax.xlane.f32.xlu0 %v2064_v62 }
0x1126   :  { %v2005_v48 = vadd.f32 %v2004_v24, %v1820_v44  ;;  %v3016_v19 = vpop.f32.mrb[49].mxu0  ;;  %v2067_v42 = vsel %vm421_vm3, %v1961_v59, -inf }
0x1127   :  { %v2007_v63 = vpop.f32.mrb[50].mxu0  ;;  %2068 = vmax.xlane.f32.xlu1 %v2067_v42 }
0x1128   :  { %v2008_v1 = vadd.f32 %v2007_v63, %v1821_v43  ;;  %v3017_v3 = vpop.f32.mrb[51].mxu0  ;;  %v2070_v16 = vsel %vm421_vm3, %v2005_v48, -inf }
0x1129   :  { %2071 = vmax.xlane.f32.xlu0 %v2070_v16  ;;  %v2051_v2 = vpop.f32.mrb[60].mxu1 }
0x112a   :  { %v2052_v4 = vadd.f32 %v2051_v2, %v1820_v44  ;;  %v3022_v15 = vpop.f32.mrb[61].mxu1  ;;  %v2073_v6 = vsel %vm421_vm3, %v2008_v1, -inf }
0x112b   :  { %2074 = vmax.xlane.f32.xlu1 %v2073_v6  ;;  %v2054_v5 = vpop.f32.mrb[62].mxu1 }
0x112c   :  { %v2055_v7 = vadd.f32 %v2054_v5, %v1821_v43  ;;  %v3023_v11 = vpop.f32.mrb[63].mxu1  ;;  %v2076_v13 = vsel %vm421_vm3, %v2052_v4, -inf }
0x112d   :  { %2077 = vmax.xlane.f32.xlu0 %v2076_v13 }
0x112e   :  { %v2079_v14 = vsel %vm421_vm3, %v2055_v7, -inf }
0x112f   :  { %2080 = vmax.xlane.f32.xlu1 %v2079_v14 }
0x113c   :  { %v2060_v18 = vpop.xlane.xlu1 %2059 }
0x113d   :  { %v2082_v22 = vsub.f32 %v1911_v47, %v2060_v18 }
0x113e   :  { %v2063_v21 = vpop.xlane.xlu0 %2062 }
0x113f   :  { %v2083_v28 = vsub.f32 %v1914_v51, %v2063_v21  ;;  %v2090_v30 = vmul.f32 1.442695, %v2082_v22 }
0x1140   :  { %2199 = vrot.lane.b32.xlu1 %v3908_v27, %s3381_s17 }
0x1141   :  { %v2092_v31 = vmul.f32 1.442695, %v2083_v28  ;;  %3308 = vpow2.f32 %v2090_v30 }
0x1143   :  { %2151 = vrot.lane.b32.xlu0 %v3892_v45, %s3381_s17  ;;  %3310 = vpow2.f32 %v2092_v31 }
0x114b   :  { %v3309_v8 = vpop.eup %3308 }
0x114c   :  { %v2106_v32 = vsel %vm421_vm3, %v3309_v8, 0.0 }
0x114d   :  { %v3311_v10 = vpop.eup %3310 }
0x114e   :  { %v2109_v34 = vsel %vm421_vm3, %v3311_v10, 0.0 }
0x1162   :  { %2107 = vadd.xlane.f32.xlu0 %v2106_v32 }
0x1164   :  { %2110 = vadd.xlane.f32.xlu1 %v2109_v34 }
0x11b2   :  { %v2066_v27 = vpop.xlane.xlu0 %2065 }
0x11b3   :  { %v2084_v35 = vsub.f32 %v1958_v57, %v2066_v27 }
0x11b4   :  { %v2069_v36 = vpop.xlane.xlu1 %2068 }
0x11b5   :  { %v2094_v45 = vmul.f32 1.442695, %v2084_v35  ;;  %v2085_v37 = vsub.f32 %v1961_v59, %v2069_v36 }
0x11b6   :  { %v2072_v33 = vpop.xlane.xlu0 %2071 }
0x11b7   :  { %3312 = vpow2.f32 %v2094_v45  ;;  %v2096_v38 = vmul.f32 1.442695, %v2085_v37  ;;  %v2086_v39 = vsub.f32 %v2005_v48, %v2072_v33  ;;  %v3351_v45 = vld [vmem:[%s4057_s5 + $0xc] ss:$20 sps:$4 sm:$0xff]   ;;  %v3352_v37 = vld [vmem:[%s4057_s5 + $0x34] ss:$20 sps:$4 sm:$0xff]  }
0x11b8   :  { %v2075_v53 = vpop.xlane.xlu1 %2074 }
0x11b9   :  { %3314 = vpow2.f32 %v2096_v38  ;;  %v2098_v56 = vmul.f32 1.442695, %v2086_v39  ;;  %v2087_v40 = vsub.f32 %v2008_v1, %v2075_v53 }
0x11ba   :  { %v2078_v49 = vpop.xlane.xlu0 %2077 }
0x11bb   :  { %3316 = vpow2.f32 %v2098_v56  ;;  %v2100_v41 = vmul.f32 1.442695, %v2087_v40  ;;  %v2088_v44 = vsub.f32 %v2052_v4, %v2078_v49  ;;  %v3222_v56 = vld [vmem:[%s4057_s5 + $0x10] ss:$20 sps:$4 sm:$0xff]  }
0x11bc   :  { %v2081_v46 = vpop.xlane.xlu1 %2080 }
0x11bd   :  { %3318 = vpow2.f32 %v2100_v41  ;;  %v2102_v43 = vmul.f32 1.442695, %v2088_v44  ;;  %v2089_v47 = vsub.f32 %v2055_v7, %v2081_v46  ;;  %v3223_v41 = vld [vmem:[%s4057_s5 + $0x38] ss:$20 sps:$4 sm:$0xff]  }
0x11be   :  { %v2152_v50 = vpop.permute.xlu0 %2151 }
0x11bf   :  { %3320 = vpow2.f32 %v2102_v43  ;;  %v2104_v0 = vmul.f32 1.442695, %v2089_v47  ;;  %3025 = vmatpush3.bf16.msra.mxu0 %v2152_v50 }
0x11c0   :  { %v2200_v51 = vpop.permute.xlu1 %2199  ;;  %3036 = vmatprep.subr.bf16.mxu0 %v3382_v17 }
0x11c1   :  { %v3313_v52 = vpop.eup %3312  ;;  %3322 = vpow2.f32 %v2104_v0  ;;  %3031 = vmatpush3.bf16.msra.mxu1 %v2200_v51 }
0x11c2   :  { %v2112_v54 = vsel %vm421_vm3, %v3313_v52, 0.0  ;;  %3042 = vmatprep.subr.bf16.mxu1 %v3382_v17 }
0x11c3   :  { %v3315_v55 = vpop.eup %3314  ;;  %2113 = vadd.xlane.f32.xlu0 %v2112_v54 }
0x11c4   :  { %v2115_v9 = vsel %vm421_vm3, %v3315_v55, 0.0 }
0x11c5   :  { %v3317_v57 = vpop.eup %3316  ;;  %2116 = vadd.xlane.f32.xlu1 %v2115_v9 }
0x11c6   :  { %v2118_v12 = vsel %vm421_vm3, %v3317_v57, 0.0 }
0x11c7   :  { %v3319_v58 = vpop.eup %3318  ;;  %2119 = vadd.xlane.f32.xlu0 %v2118_v12 }
0x11c8   :  { %v2121_v59 = vsel %vm421_vm3, %v3319_v58, 0.0 }
0x11c9   :  { %v3321_v60 = vpop.eup %3320  ;;  %2122 = vadd.xlane.f32.xlu1 %v2121_v59 }
0x11ca   :  { %v2124_v62 = vsel %vm421_vm3, %v3321_v60, 0.0 }
0x11cb   :  { %v3323_v24 = vpop.eup %3322  ;;  %2125 = vadd.xlane.f32.xlu0 %v2124_v62 }
0x11cc   :  { %v2127_v48 = vsel %vm421_vm3, %v3323_v24, 0.0 }
0x11cd   :  { %2128 = vadd.xlane.f32.xlu1 %v2127_v48 }
0x11de   :  { %2247 = vrot.lane.b32.xlu1 %v3906_v25, %s3381_s17 }
0x11e1   :  { %2295 = vrot.lane.b32.xlu0 %v3916_v61, %s3381_s17 }
0x11ef   :  { %v2108_v19 = vpop.xlane.xlu0 %2107 }
0x11f0   :  { %3324 = vrcp.f32 %v2108_v19 }
0x11f1   :  { %v2111_v42 = vpop.xlane.xlu1 %2110 }
0x11f2   :  { %3326 = vrcp.f32 %v2111_v42 }
0x11fa   :  { %v3325_v63 = vpop.eup %3324 }
0x11fb   :  { %v2138_v3 = vmul.f32 %v3325_v63, %v3309_v8 }
0x11fc   :  { %v3327_v1 = vpop.eup %3326 }
0x11fd   :  { %v2139_v16 = vmul.f32 %v3327_v1, %v3311_v10 }
0x11ff   :  { %v2146_v2 = vpack.c.bf16 %v2139_v16, %v2138_v3 }
0x1201   :  { %3027 = vmatmul.mubr.msk.bf16.vlgmr.msra.gmra.mrb[52].mxu0 %vm421_vm3, %v2146_v2 }
0x1202   :  { %3038 = vmatprep.mubr.msk.bf16.mxu0 %vm3383_vm1, %v3382_v17 }
0x1250   :  { %v2114_v4 = vpop.xlane.xlu0 %2113 }
0x1251   :  { %3328 = vrcp.f32 %v2114_v4 }
0x1252   :  { %v2117_v25 = vpop.xlane.xlu1 %2116 }
0x1253   :  { %3330 = vrcp.f32 %v2117_v25 }
0x1254   :  { %v2120_v15 = vpop.xlane.xlu0 %2119 }
0x1255   :  { %3332 = vrcp.f32 %v2120_v15 }
0x1256   :  { %v2123_v61 = vpop.xlane.xlu1 %2122 }
0x1257   :  { %3334 = vrcp.f32 %v2123_v61 }
0x1258   :  { %v2126_v6 = vpop.xlane.xlu0 %2125 }
0x1259   :  { %3336 = vrcp.f32 %v2126_v6 }
0x125a   :  { %v2129_v5 = vpop.xlane.xlu1 %2128 }
0x125b   :  { %v3329_v7 = vpop.eup %3328  ;;  %3338 = vrcp.f32 %v2129_v5 }
0x125c   :  { %v2140_v13 = vmul.f32 %v3329_v7, %v3313_v52  ;;  %v2296_v8 = vpop.permute.xlu0 %2295 }
0x125d   :  { %v3331_v11 = vpop.eup %3330 }
0x125e   :  { %v2141_v14 = vmul.f32 %v3331_v11, %v3315_v55  ;;  %v2248_v18 = vpop.permute.xlu1 %2247 }
0x125f   :  { %v3333_v21 = vpop.eup %3332  ;;  %3037 = vmatpush3.bf16.msra.mxu0 %v2248_v18 }
0x1260   :  { %v2147_v22 = vpack.c.bf16 %v2141_v14, %v2140_v13  ;;  %3048 = vmatprep.subr.bf16.mxu0 %v3382_v17  ;;  %v2142_v30 = vmul.f32 %v3333_v21, %v3317_v57 }
0x1261   :  { %v3335_v28 = vpop.eup %3334 }
0x1262   :  { %v2143_v31 = vmul.f32 %v3335_v28, %v3319_v58  ;;  %3033 = vmatmul.mubr.msk.bf16.vlgmr.msra.gmra.mrb[64].mxu1 %vm421_vm3, %v2147_v22  ;;  %v3353_v28 = vld [vmem:[%s4058_s6 + $0x8] sm:$0xff]  }
0x1263   :  { %v3337_v10 = vpop.eup %3336  ;;  %3043 = vmatpush3.bf16.msra.mxu1 %v2296_v8  ;;  %3044 = vmatprep.mubr.msk.bf16.mxu1 %vm3383_vm1, %v3382_v17 }
0x1264   :  { %v2148_v32 = vpack.c.bf16 %v2143_v31, %v2142_v30  ;;  %3056 = vmatprep.subr.bf16.mxu1 %v3382_v17  ;;  %v2144_v27 = vmul.f32 %v3337_v10, %v3321_v60  ;;  %v3356_v30 = vld [vmem:[%s4058_s6 + $0x10] sm:$0xff]  }
0x1265   :  { %v3339_v34 = vpop.eup %3338 }
0x1266   :  { %v2145_v35 = vmul.f32 %v3339_v34, %v3323_v24  ;;  %3039 = vmatmul.mubr.msk.bf16.vlgmr.msra.gmra.mrb[56].mxu0 %vm421_vm3, %v2148_v32 }
0x1267   :  { %3052 = vmatprep.mubr.msk.bf16.mxu0 %vm3383_vm1, %v3382_v17  ;;  %3049 = vmatpush3.bf16.msra.mxu0 %v3222_v56 }
0x1268   :  { %v2149_v36 = vpack.c.bf16 %v2145_v35, %v2144_v27  ;;  %3050 = vmatprep.subr.bf16.mxu0 %v3382_v17 }
0x126a   :  { %3045 = vmatmul.mubr.msk.bf16.vlgmr.msra.gmra.mrb[68].mxu1 %vm421_vm3, %v2149_v36 }
0x126b   :  { %3057 = vmatpush3.bf16.msra.mxu1 %v3351_v45  ;;  %3060 = vmatprep.mubr.msk.bf16.mxu1 %vm3383_vm1, %v3382_v17 }
0x126c   :  { %3058 = vmatprep.subr.bf16.mxu1 %v3382_v17  ;;  %3051 = vmatpush3.bf16.msra.mxu0 %v3223_v41 }
0x126d   :  { %3064 = vmatprep.subr.bf16.mxu0 %v3382_v17 }
0x126f   :  { %3059 = vmatpush3.bf16.msra.mxu1 %v3352_v37  ;;  %v2449_v37 = vsub.s32 5, %v3483_v26 }
0x12d4   :  { %v2191_v33 = vpop.f32.mrb[52].mxu0 }
0x12d5   :  { %v3028_v38 = vpop.f32.mrb[53].mxu0 }
0x12d6   :  { %v2194_v39 = vpop.f32.mrb[54].mxu0 }
0x12d7   :  { %v3029_v53 = vpop.f32.mrb[55].mxu0 }
0x1335   :  { %v2239_v40 = vpop.f32.mrb[64].mxu1 }
0x1336   :  { %v3034_v49 = vpop.f32.mrb[65].mxu1 }
0x1337   :  { %v2242_v44 = vpop.f32.mrb[66].mxu1 }
0x1338   :  { %v3189_v46 = vpack.i.bf16 %v2242_v44, %v2239_v40  ;;  %v3035_v43 = vpop.f32.mrb[67].mxu1 }
0x1339   :  { %v2287_v47 = vpop.f32.mrb[56].mxu0 }
0x133a   :  { %v3040_v50 = vpop.f32.mrb[57].mxu0  ;;  %3190 = vrot.lane.b32.xlu1 %v3189_v46, %s3388_s18 }
0x133b   :  { %v2290_v0 = vpop.f32.mrb[58].mxu0 }
0x133c   :  { %v3194_v51 = vpack.i.bf16 %v2290_v0, %v2287_v47  ;;  %v3041_v52 = vpop.f32.mrb[59].mxu0 }
0x133d   :  { %v2335_v54 = vpop.f32.mrb[68].mxu1 }
0x133e   :  { %3195 = vrot.lane.b32.xlu0 %v3194_v51, %s3389_s22  ;;  %v3046_v55 = vpop.f32.mrb[69].mxu1 }
0x133f   :  { %v2338_v9 = vpop.f32.mrb[70].mxu1 }
0x1340   :  { %v3199_v57 = vpack.i.bf16 %v2338_v9, %v2335_v54  ;;  %v3047_v12 = vpop.f32.mrb[71].mxu1 }
0x1342   :  { %3200 = vrot.lane.b32.xlu1 %v3199_v57, %s3390_s25 }
0x13ac   :  { %v3191_v58 = vpop.permute.xlu1 %3190 }
0x13ad   :  { %v3193_v60 = vunpack.i.h.bf16 %v3191_v58  ;;  %v3192_v62 = vunpack.i.l.bf16 %v3191_v58 }
0x13af   :  { %v2367_v42 = vsel %vm223_vm2, %v2194_v39, %v3193_v60  ;;  %v2366_v63 = vsel %vm223_vm2, %v2191_v33, %v3192_v62  ;;  %v2450_v39 = vrot.slane %v3875_v29, %v2449_v37 }
0x13b0   :  { %v3196_v59 = vpop.permute.xlu0 %3195 }
0x13b1   :  { %v3198_v24 = vunpack.i.h.bf16 %v3196_v59  ;;  %v3197_v48 = vunpack.i.l.bf16 %v3196_v59 }
0x13b3   :  { %v2368_v16 = vsel %vm421_vm3, %v2366_v63, %v3197_v48  ;;  %v2369_v2 = vsel %vm421_vm3, %v2367_v42, %v3198_v24  ;;  %v3392_v24 = vmov 0.0|0.0  }
0x13b4   :  { %v3201_v19 = vpop.permute.xlu1 %3200  ;;  %3083 = vmatprep.subr.bf16.mxu1 %v3392_v24 }
0x13b5   :  { %v3203_v1 = vunpack.i.h.bf16 %v3201_v19  ;;  %v3202_v3 = vunpack.i.l.bf16 %v3201_v19 }
0x13b7   :  { %v2371_v4 = vsel %vm730_vm4, %v2369_v2, %v3203_v1  ;;  %v2370_v25 = vsel %vm730_vm4, %v2368_v16, %v3202_v3  ;;  %v2579_v16 = vsub.s32 6, %v3483_v26 }
0x13b8   :  { %v2372_v15 = vpack.c.bf16 %v2371_v4, %v2370_v25 }
0x13b9   :  { %v2580_v25 = vrot.slane %v3875_v29, %v2579_v16 }
0x13ba   :  { %3053 = vmatmul.mubr.msk.bf16.vlgmr.msra.gmra.mrb[60].mxu0 %vm54_vm0, %v2372_v15 }
0x13bb   :  { %3072 = vmatprep.mubr.msk.bf16.mxu0 %vm3383_vm1, %v3382_v17 }
0x148d   :  { %v2422_v61 = vpop.f32.mrb[60].mxu0 }
0x148e   :  { %v2429_v6 = vadd.f32 %v2422_v61, %v3853_v20  ;;  %v3054_v5 = vpop.f32.mrb[61].mxu0  ;;  %v3354_v20 = vld [vmem:[%s4058_s6] sm:$0xff]  }
0x148f   :  { %v2425_v7 = vpop.f32.mrb[62].mxu0 }
0x1490   :  { %v2430_v11 = vadd.f32 %v2425_v7, %v3856_v23  ;;  %v3055_v13 = vpop.f32.mrb[63].mxu0  ;;  %v2431_v14 = vmul.f32 %v2429_v6, %v2429_v6  ;;  %v3355_v23 = vld [vmem:[%s4058_s6 + $0x18] sm:$0xff]  }
0x1492   :  { %v2433_v18 = vsel %vm54_vm0, %v2431_v14, 0.0  ;;  %v2432_v21 = vmul.f32 %v2430_v11, %v2430_v11 }
0x1493   :  { %2434 = vadd.xlane.f32.xlu0 %v2433_v18 }
0x1494   :  { %v2436_v22 = vsel %vm54_vm0, %v2432_v21, 0.0 }
0x1495   :  { %2437 = vadd.xlane.f32.xlu1 %v2436_v22 }
0x14a6   :  { %2505 = vrot.lane.b32.xlu1 %v3353_v28, %s3381_s17 }
0x14a9   :  { %2503 = vrot.lane.b32.xlu0 %v3354_v20, %s3381_s17 }
0x14aa   :  { %2509 = vrot.lane.b32.xlu1 %v3355_v23, %s3381_s17 }
0x14ad   :  { %2507 = vrot.lane.b32.xlu0 %v3356_v30, %s3381_s17 }
0x1520   :  { %v2435_v31 = vpop.xlane.xlu0 %2434 }
0x1521   :  { %v2439_v8 = vmul.f32 0.03125, %v2435_v31 }
0x1522   :  { %v2438_v10 = vpop.xlane.xlu1 %2437 }
0x1523   :  { %v2441_v32 = vadd.f32 1e-06, %v2439_v8  ;;  %v2440_v34 = vmul.f32 0.03125, %v2438_v10 }
0x1524   :  { %v2504_v27 = vpop.permute.xlu0 %2503 }
0x1525   :  { %3340 = vrsqrt.f32 %v2441_v32  ;;  %v2442_v35 = vadd.f32 1e-06, %v2440_v34  ;;  %3065 = vmatpush3.bf16.msra.mxu0 %v2504_v27 }
0x1526   :  { %3066 = vmatprep.subr.bf16.mxu0 %v3382_v17  ;;  %v2506_v36 = vpop.permute.xlu1 %2505 }
0x1527   :  { %3342 = vrsqrt.f32 %v2442_v35 }
0x1528   :  { %v2508_v45 = vpop.permute.xlu0 %2507 }
0x1529   :  { %3067 = vmatpush3.bf16.msra.mxu0 %v2506_v36 }
0x152a   :  { %3068 = vmatprep.subr.bf16.mxu0 %v3382_v17  ;;  %v2510_v44 = vpop.permute.xlu1 %2509 }
0x152d   :  { %3069 = vmatpush3.bf16.msra.mxu0 %v2508_v45 }
0x152e   :  { %3070 = vmatprep.subr.bf16.mxu0 %v3382_v17 }
0x152f   :  { %v3341_v33 = vpop.eup %3340 }
0x1530   :  { %v2445_v38 = vmul.f32 %v3341_v33, %v2429_v6 }
0x1531   :  { %v3343_v53 = vpop.eup %3342  ;;  %3071 = vmatpush3.bf16.msra.mxu0 %v2510_v44 }
0x1532   :  { %v2446_v56 = vmul.f32 %v3343_v53, %v2430_v11  ;;  %v2451_v40 = vmul.f32 %v2450_v39, %v2445_v38 }
0x1534   :  { %v2452_v49 = vmul.f32 %v2450_v39, %v2446_v56 }
0x1536   :  { %v2453_v41 = vpack.c.bf16 %v2452_v49, %v2451_v40 }
0x1538   :  { %3061 = vmatmul.mubr.msk.bf16.vlgmr.msra.gmra.mrb[72].mxu1 %vm54_vm0, %v2453_v41 }
0x1539   :  { %3080 = vmatprep.mubr.msk.f32.mxu1 %vm3383_vm1, %v3382_v17 }
0x160b   :  { %v2493_v46 = vpop.f32.mrb[72].mxu1 }
0x160c   :  { %v3062_v43 = vpop.f32.mrb[73].mxu1  ;;  %v2500_v50 = vmax.f32 %v2493_v46, 0.0 }
0x160d   :  { %v2496_v47 = vpop.f32.mrb[74].mxu1 }
0x160e   :  { %v2501_v0 = vmax.f32 %v2496_v47, 0.0  ;;  %v3063_v51 = vpop.f32.mrb[75].mxu1 }
0x1610   :  { %v2502_v52 = vpack.c.bf16 %v2501_v0, %v2500_v50 }
0x1612   :  { %3073 = vmatmul.mubr.msk.bf16.vlgmr.msra.gmra.mrb[64].mxu0 %vm914_vm5, %v2502_v52 }
0x16e5   :  { %v2552_v54 = vpop.f32.mrb[64].mxu0 }
0x16e6   :  { %v2559_v55 = vadd.f32 %v2552_v54, %v2429_v6  ;;  %v3074_v9 = vpop.f32.mrb[65].mxu0 }
0x16e7   :  { %v2555_v57 = vpop.f32.mrb[66].mxu0 }
0x16e8   :  { %v2561_v12 = vmul.f32 %v2559_v55, %v2559_v55  ;;  %v2560_v58 = vadd.f32 %v2555_v57, %v2430_v11  ;;  %v3075_v59 = vpop.f32.mrb[67].mxu0  ;;  %v2583_v11 = vld [vmem:[%s4056_s4] sm:$0x3] }
0x16ea   :  { %v2562_v60 = vmul.f32 %v2560_v58, %v2560_v58  ;;  %v2563_v17 = vsel %vm54_vm0, %v2561_v12, 0.0 }
0x16eb   :  { %2564 = vadd.xlane.f32.xlu0 %v2563_v17 }
0x16ec   :  { %v2566_v62 = vsel %vm54_vm0, %v2562_v60, 0.0 }
0x16ed   :  { %2567 = vadd.xlane.f32.xlu1 %v2566_v62 }
0x1778   :  { %v2565_v48 = vpop.xlane.xlu0 %2564 }
0x1779   :  { %v2569_v19 = vmul.f32 0.03125, %v2565_v48 }
0x177a   :  { %v2568_v42 = vpop.xlane.xlu1 %2567 }
0x177b   :  { %v2571_v63 = vadd.f32 1e-06, %v2569_v19  ;;  %v2570_v1 = vmul.f32 0.03125, %v2568_v42 }
0x177d   :  { %3344 = vrsqrt.f32 %v2571_v63  ;;  %v2572_v3 = vadd.f32 1e-06, %v2570_v1 }
0x177f   :  { %3346 = vrsqrt.f32 %v2572_v3 }
0x1787   :  { %v3345_v2 = vpop.eup %3344 }
0x1788   :  { %v2575_v4 = vmul.f32 %v3345_v2, %v2559_v55 }
0x1789   :  { %v3347_v15 = vpop.eup %3346 }
0x178a   :  { %v2576_v61 = vmul.f32 %v3347_v15, %v2560_v58  ;;  %v2581_v6 = vmul.f32 %v2580_v25, %v2575_v4 }
0x178c   :  { %v2582_v5 = vmul.f32 %v2580_v25, %v2576_v61 }
0x178e   :  { %v3084_v7 = vpack.c.bf16 %v2582_v5, %v2581_v6 }
0x1790   :  { %3085 = vmatpush3.bf16.msra.mxu1 %v3084_v7 }
0x1793   :  { %3081 = vmatmul.mubr.msk.f32.vlgmr.msra.gmra.mrb[76].mxu1 %vm421_vm3, %v2583_v11 }
0x1866   :  { %v2653_v13 = vpop.f32.mrb[76].mxu1 }
0x1867   :  { %v2657_v14 = vmul.f32 %v2653_v13, %v2653_v13  ;;  %v3082_v26 = vpop.f32.mrb[77].mxu1 }
0x1869   :  { %v2659_v18 = vsel %vm2658_vm6, %v2657_v14, 0.0 }
0x186a   :  { %2660 = vadd.xlane.f32.xlu0 %v2659_v18 }
0x18f7   :  { %v2661_v21 = vpop.xlane.xlu0 %2660 }
0x18f8   :  { %v2662_v29 = vmax.f32 %v2661_v21, 1e-24 }
0x18fa   :  { %3348 = vrsqrt.f32 %v2662_v29 }
0x1904   :  { %v3349_v22 = vpop.eup %3348 }
0x1905   :  { %v2664_v28 = vmul.f32 %v3349_v22, %v2653_v13 }
0x1907   :  { %2665 = vst.msk [vmem:[#allocation2] sm:$0x3] %vm2658_vm6, %v2664_v28 }
0x1908   :  { %3368 = shalt.err (!%p3365_p4)
}
0x1909   :  { %s3369_s11 = scalar_lea.hbm %s4060_s8, 32 }
0x190a   :  { %p3370_p5 = scmp.ne.s32.totalorder %s4060_s8, %s3369_s11  ;;  %p3373_p6 = scmp.lt.u32.totalorder %s3369_s11, %s4060_s8 }
0x190c   :  { %p3375_p7 = pnand %p3373_p6, %p3370_p5 }
0x190e   :  { %3378 = shalt.err (!%p3375_p7)
}
0x190f   :  { %2675 = dma.vmem_to_hbm [thread:$0]  %s2673_s30, 32, %s4060_s8, [#allocation3]  }
0x1910   :  { %3379 = dma.done.wait [#allocation3], 32  }
0x1911   :  { %3380 = vsyncadd [#allocation3], 4294967264 }
0x1912   :  { %2679 = vsyncpa [#allocation3], 1 }

</bundles_post_ra>
